<compile_context>
chip_gen: v7x
topology: tpu7x:2x2x1
jax: 0.10.0
libtpu: 0.0.40
codegen_flags: <defaults>
</compile_context>

<pallas_src>
import functools

import jax
import jax.numpy as jnp
from jax.experimental import pallas as pl
from jax.experimental.pallas import tpu as pltpu

EPS = 1e-5
NEG_SLOPE = 0.1
LANE = 128


def _round_up(x, m):
    return ((x + m - 1) // m) * m


def _largest_divisor_leq(n, cap):
    cap = max(1, min(n, cap))
    for d in range(cap, 0, -1):
        if n % d == 0:
            return d
    return 1


# --------------------------------------------------------------------------- #
# Pass 1: direct conv (no HBM im2col) + per-tile channel sum / sum-of-squares  #
# --------------------------------------------------------------------------- #
def conv_stats_kernel(x_ref, w_ref, conv_ref, sum_ref, sumsq_ref, *,
                      stride, tr, wo):
    # x_ref:    (1, TRH, Wp, Cin)   one padded-input row tile (+ Kh-1 halo rows)
    # w_ref:    (Kh, Kw, Cin, Cp)
    # conv_ref: (1, TR*Wo, Cp)      sum_ref/sumsq_ref: (1, 1, Cp)
    kh, kw, cin, cp = w_ref.shape
    m_t = tr * wo

    x = x_ref[0]                                            # (TRH, Wp, Cin)
    acc = jnp.zeros((m_t, cp), jnp.float32)
    # Kh*Kw window extraction happens in VMEM (values), not HBM.
    # For large Cin one could fuse the kj loop into the matmul K dim (Kw*Cin)
    # for better MXU depth; kept as separate small dots for lowering simplicity.
    for ki in range(kh):
        for kj in range(kw):
            if stride == 1:
                win = x[ki:ki + tr, kj:kj + wo, :]          # (tr, wo, cin)
            else:
                win = jax.lax.slice(
                    x, (ki, kj, 0),
                    (ki + (tr - 1) * stride + 1, kj + (wo - 1) * stride + 1, cin),
                    strides=(stride, stride, 1))
            lhs = win.reshape(m_t, cin)
            acc = acc + jnp.dot(lhs, w_ref[ki, kj],
                                preferred_element_type=jnp.float32)

    conv_ref[0] = acc.astype(conv_ref.dtype)                # bf16 HBM round-trip
    # Partial stats from the f32 accumulator (before the downcast).
    sum_ref[0] = jnp.sum(acc, axis=0, keepdims=True)        # (1, Cp)
    sumsq_ref[0] = jnp.sum(acc * acc, axis=0, keepdims=True)


# --------------------------------------------------------------------------- #
# Pass 2: y = conv*scale + shift (BN folded in wrapper) + LeakyReLU(0.1)       #
# --------------------------------------------------------------------------- #
def bn_act_kernel(conv_ref, scale_ref, shift_ref, o_ref):
    y = conv_ref[...].astype(jnp.float32) * scale_ref[...] + shift_ref[...]
    o_ref[...] = jnp.where(y > 0, y, NEG_SLOPE * y).astype(o_ref.dtype)


@functools.partial(jax.jit, static_argnames=(
    "stride", "padding", "tile_m", "matmul_dtype", "conv_dtype", "out_layout"))
def cnn_block_forward(x_nchw, weight_oihw, gamma, beta, *, stride=1, padding=1,
                      tile_m=512, matmul_dtype=jnp.bfloat16,
                      conv_dtype=jnp.bfloat16, out_layout="NCHW"):
    """Fused Conv2d (no bias) + BatchNorm2d (batch stats) + LeakyReLU(0.1)."""
    n, cin, h, w = x_nchw.shape
    cout, cin_w, kh, kw = weight_oihw.shape
    assert cin == cin_w

    ho = (h + 2 * padding - kh) // stride + 1
    wo = (w + 2 * padding - kw) // stride + 1
    wp = w + 2 * padding
    cp = _round_up(cout, LANE)                       # lane-dense channel padding

    m_itemsize = jnp.dtype(matmul_dtype).itemsize
    c_itemsize = jnp.dtype(conv_dtype).itemsize

    # --- row-tile size: ~tile_m output rows of (Wo, Cp) per grid step ---------
    tr = max(1, min(ho, max(1, tile_m // max(wo, 1))))
    # keep the (double-buffered) input row-tile under a VMEM byte budget
    while tr > 1 and ((tr - 1) * stride + kh) * wp * cin * m_itemsize > 8 * 1024 * 1024:
        tr = max(1, tr // 2)
    t = -(-ho // tr)                                 # ceil(ho / tr)
    ho_pad = t * tr
    trh = (tr - 1) * stride + kh                     # padded rows per tile (halo incl.)

    # --- NCHW -> NHWC, pad H/W (extra zero rows so the last tile has its halo) -
    x_nhwc = jnp.transpose(x_nchw, (0, 2, 3, 1)).astype(jnp.float32)
    rows_needed = (ho_pad - 1) * stride + kh
    pad_bottom = padding + max(0, rows_needed - (h + 2 * padding))
    x_pad = jnp.pad(x_nhwc, ((0, 0), (padding, pad_bottom),
                             (padding, padding), (0, 0))).astype(matmul_dtype)

    # Overlapping row tiles: replaces the Kh*Kw x materialized im2col.
    x_tiles = jnp.stack(
        [x_pad[:, tidx * tr * stride: tidx * tr * stride + trh, :, :]
         for tidx in range(t)], axis=1)              # (N, T, TRH, Wp, Cin)
    nt = n * t
    x_tiles = x_tiles.reshape(nt, trh, wp, cin)

    # Weights: (Cout, Cin, Kh, Kw) -> (Kh, Kw, Cin, Cp), zero-padded channels.
    w_kkcc = jnp.transpose(weight_oihw, (2, 3, 1, 0)).astype(jnp.float32)
    w_kkcc = jnp.pad(w_kkcc, ((0, 0), (0, 0), (0, 0), (0, cp - cout)))
    w_kkcc = w_kkcc.astype(matmul_dtype)

    m_t = tr * wo

    # ---- Pass 1: conv + per-tile partial stats (both axes fully parallel) ---- #
    vmem1 = (2 * (trh * wp * cin * m_itemsize
                  + kh * kw * cin * cp * m_itemsize
                  + m_t * cp * c_itemsize)
             + m_t * cp * 4 + 512 * 1024)
    vmem1 = int(min(64 * 1024 * 1024, max(32 * 1024 * 1024, 2 * vmem1)))

    conv_t, psum, psumsq = pl.pallas_call(
        functools.partial(conv_stats_kernel, stride=stride, tr=tr, wo=wo),
        out_shape=(
            jax.ShapeDtypeStruct((nt, m_t, cp), conv_dtype),
            jax.ShapeDtypeStruct((nt, 1, cp), jnp.float32),
            jax.ShapeDtypeStruct((nt, 1, cp), jnp.float32),
        ),
        grid_spec=pltpu.PrefetchScalarGridSpec(
            num_scalar_prefetch=0,
            grid=(nt,),
            in_specs=[
                pl.BlockSpec((1, trh, wp, cin), lambda i: (i, 0, 0, 0)),
                pl.BlockSpec((kh, kw, cin, cp), lambda i: (0, 0, 0, 0)),
            ],
            out_specs=[
                pl.BlockSpec((1, m_t, cp), lambda i: (i, 0, 0)),
                pl.BlockSpec((1, 1, cp), lambda i: (i, 0, 0)),   # per-tile partials
                pl.BlockSpec((1, 1, cp), lambda i: (i, 0, 0)),
            ],
        ),
        compiler_params=pltpu.CompilerParams(
            dimension_semantics=("parallel",),       # no resident accumulators ->
            vmem_limit_bytes=vmem1,                  # megacore-shardable (v7x)
        ),
        cost_estimate=pl.CostEstimate(
            flops=2 * nt * m_t * kh * kw * cin * cp,
            transcendentals=0,
            bytes_accessed=int(nt * trh * wp * cin * m_itemsize
                               + kh * kw * cin * cp * m_itemsize
                               + nt * m_t * cp * (c_itemsize + 8)),
        ),
    )(x_tiles, w_kkcc)

    # ---- Tiny stat reduction + BN scale/shift fold (hoisted out of pass 2) --- #
    m_true = float(n * ho * wo)                      # padded rows are exact zeros
    ch_sum = jnp.sum(psum, axis=0)                   # (1, Cp)
    ch_sumsq = jnp.sum(psumsq, axis=0)               # (1, Cp)
    mean = ch_sum / m_true
    var = jnp.maximum(ch_sumsq / m_true - mean * mean, 0.0)
    inv_std = jax.lax.rsqrt(var + EPS)
    gamma_p = jnp.pad(gamma.astype(jnp.float32), (0, cp - cout)).reshape(1, cp)
    beta_p = jnp.pad(beta.astype(jnp.float32), (0, cp - cout)).reshape(1, cp)
    scale = (gamma_p * inv_std).reshape(1, 1, cp)
    shift = (beta_p - mean * gamma_p * inv_std).reshape(1, 1, cp)

    # ---- Pass 2: BN apply + LeakyReLU, streaming, aliased onto conv buffer --- #
    bytes_per_tile = m_t * cp * c_itemsize
    b2 = _largest_divisor_leq(nt, max(1, (4 * 1024 * 1024) // max(bytes_per_tile, 1)))
    vmem2 = int(min(64 * 1024 * 1024,
                    max(32 * 1024 * 1024, 8 * b2 * bytes_per_tile)))

    out_t = pl.pallas_call(
        bn_act_kernel,
        out_shape=jax.ShapeDtypeStruct((nt, m_t, cp), conv_dtype),
        grid_spec=pltpu.PrefetchScalarGridSpec(
            num_scalar_prefetch=0,
            grid=(nt // b2,),
            in_specs=[
                pl.BlockSpec((b2, m_t, cp), lambda i: (i, 0, 0)),
                pl.BlockSpec((1, 1, cp), lambda i: (0, 0, 0)),
                pl.BlockSpec((1, 1, cp), lambda i: (0, 0, 0)),
            ],
            out_specs=pl.BlockSpec((b2, m_t, cp), lambda i: (i, 0, 0)),
        ),
        compiler_params=pltpu.CompilerParams(
            dimension_semantics=("parallel",),
            vmem_limit_bytes=vmem2,
        ),
        input_output_aliases={0: 0},                 # overwrite conv_t in place
        cost_estimate=pl.CostEstimate(
            flops=4 * nt * m_t * cp,
            transcendentals=0,
            bytes_accessed=2 * nt * m_t * cp * c_itemsize,
        ),
    )(conv_t, scale, shift)

    # ---- Epilogue: un-pad + layout ------------------------------------------ #
    out = out_t.reshape(n, ho_pad, wo, cp)[:, :ho, :, :cout].astype(x_nchw.dtype)
    if out_layout == "NHWC":
        return out
    # NCHW to match nn.Conv2d/BatchNorm2d semantics (costs one transpose pass;
    # use out_layout="NHWC" for channels-last consumers).
    return jnp.transpose(out, (0, 3, 1, 2))


def reference_forward(x_nchw, weight_oihw, gamma, beta, *, stride=1, padding=1):
    """Pure-JAX reference: conv + training-mode BN + LeakyReLU."""
    conv = jax.lax.conv_general_dilated(
        x_nchw.astype(jnp.float32), weight_oihw.astype(jnp.float32),
        window_strides=(stride, stride),
        padding=[(padding, padding), (padding, padding)],
        dimension_numbers=("NCHW", "OIHW", "NCHW"))
    mean = jnp.mean(conv, axis=(0, 2, 3), keepdims=True)
    var = jnp.mean((conv - mean) ** 2, axis=(0, 2, 3), keepdims=True)
    y = (conv - mean) * jax.lax.rsqrt(var + EPS)
    y = y * gamma.reshape(1, -1, 1, 1) + beta.reshape(1, -1, 1, 1)
    return jnp.where(y > 0, y, NEG_SLOPE * y)


if __name__ == "__main__":
    key = jax.random.PRNGKey(0)
    k_x, k_w = jax.random.split(key)

    # Small shapes: batch=2, in_channels=4, out_channels=8, spatial=16,
    # kernel_size=3, stride=1, padding=1, bn_act=True (so conv has no bias).
    N, CIN, COUT, H, W, K = 2, 4, 8, 16, 16, 3

    x = jax.random.normal(k_x, (N, CIN, H, W), dtype=jnp.float32)
    weight = jax.random.normal(k_w, (COUT, CIN, K, K), dtype=jnp.float32) * 0.1
    gamma = jnp.ones((COUT,), dtype=jnp.float32)   # BatchNorm2d default init
    beta = jnp.zeros((COUT,), dtype=jnp.float32)

    # Default perf path: bf16 MXU inputs + bf16 conv round-trip.
    # tile_m=128 -> TR=8 rows/tile, 4 row tiles: exercises pipelining + partial stats.
    out_bf16 = jax.block_until_ready(
        cnn_block_forward(x, weight, gamma, beta, stride=1, padding=1, tile_m=128))

    # f32 path: validates the conv/BN/LeakyReLU algorithm exactly.
    out_f32 = jax.block_until_ready(
        cnn_block_forward(x, weight, gamma, beta, stride=1, padding=1, tile_m=128,
                          matmul_dtype=jnp.float32, conv_dtype=jnp.float32))

    ref = jax.block_until_ready(
        reference_forward(x, weight, gamma, beta, stride=1, padding=1))
    ref_b = jax.block_until_ready(reference_forward(
        x.astype(jnp.bfloat16).astype(jnp.float32),
        weight.astype(jnp.bfloat16).astype(jnp.float32),
        gamma, beta, stride=1, padding=1))

    assert out_f32.shape == (N, COUT, H, W), out_f32.shape
    assert out_bf16.shape == (N, COUT, H, W), out_bf16.shape
    assert jnp.allclose(out_f32, ref, rtol=1e-4, atol=1e-4), \
        float(jnp.max(jnp.abs(out_f32 - ref)))
    assert jnp.allclose(out_bf16, ref_b, rtol=2e-2, atol=2e-2), \
        float(jnp.max(jnp.abs(out_bf16 - ref_b)))

    print("KERNEL_OK")
</pallas_src>

<mosaic_0001>
module attributes {stable_mosaic.version = 11 : i64} {
  func.func @bn_act_kernel(%arg0: i32, %arg1: memref<4x128x128xbf16, #tpu.memory_space<vmem>>, %arg2: memref<1x1x128xf32, #tpu.memory_space<vmem>>, %arg3: memref<1x1x128xf32, #tpu.memory_space<vmem>>, %arg4: memref<4x128x128xbf16, #tpu.memory_space<vmem>>) attributes {dimension_semantics = [#tpu.dimension_semantics<parallel>], iteration_bounds = array<i64: 1>, scalar_prefetch = 0 : i64, scratch_operands = 0 : i64, tpu.core_type = #tpu.core_type<tc>, window_params = [{transform_indices = @transform_0, window_bounds = array<i64: 4, 128, 128>}, {pipeline_mode = #tpu.pipeline_mode<synchronous>, transform_indices = @transform_1, window_bounds = array<i64: 1, 1, 128>}, {pipeline_mode = #tpu.pipeline_mode<synchronous>, transform_indices = @transform_2, window_bounds = array<i64: 1, 1, 128>}, {transform_indices = @transform_3, window_bounds = array<i64: 4, 128, 128>}]} {
    %c0 = arith.constant 0 : index
    %c0_0 = arith.constant 0 : index
    %c0_1 = arith.constant 0 : index
    %0 = vector.load %arg1[%c0, %c0_0, %c0_1] : memref<4x128x128xbf16, #tpu.memory_space<vmem>>, vector<4x128x128xbf16>
    %1 = arith.extf %0 : vector<4x128x128xbf16> to vector<4x128x128xf32>
    %c0_2 = arith.constant 0 : index
    %c0_3 = arith.constant 0 : index
    %c0_4 = arith.constant 0 : index
    %2 = vector.load %arg2[%c0_2, %c0_3, %c0_4] : memref<1x1x128xf32, #tpu.memory_space<vmem>>, vector<1x1x128xf32>
    %3 = vector.broadcast %2 : vector<1x1x128xf32> to vector<4x128x128xf32>
    %4 = arith.mulf %1, %3 : vector<4x128x128xf32>
    %c0_5 = arith.constant 0 : index
    %c0_6 = arith.constant 0 : index
    %c0_7 = arith.constant 0 : index
    %5 = vector.load %arg3[%c0_5, %c0_6, %c0_7] : memref<1x1x128xf32, #tpu.memory_space<vmem>>, vector<1x1x128xf32>
    %6 = vector.broadcast %5 : vector<1x1x128xf32> to vector<4x128x128xf32>
    %7 = arith.addf %4, %6 : vector<4x128x128xf32>
    %cst = arith.constant 0.000000e+00 : f32
    %8 = vector.broadcast %cst : f32 to vector<4x128x128xf32>
    %9 = arith.cmpf ogt, %7, %8 : vector<4x128x128xf32>
    %cst_8 = arith.constant 1.000000e-01 : f32
    %10 = vector.broadcast %cst_8 : f32 to vector<4x128x128xf32>
    %11 = arith.mulf %10, %7 : vector<4x128x128xf32>
    %12 = arith.select %9, %7, %11 : vector<4x128x128xi1>, vector<4x128x128xf32>
    %13 = arith.truncf %12 : vector<4x128x128xf32> to vector<4x128x128xbf16>
    %c0_9 = arith.constant 0 : index
    %c0_10 = arith.constant 0 : index
    %c0_11 = arith.constant 0 : index
    %14 = vector.load %arg4[%c0_9, %c0_10, %c0_11] : memref<4x128x128xbf16, #tpu.memory_space<vmem>>, vector<4x128x128xbf16>
    tpu.vector_store %arg4[%c0_9, %c0_10, %c0_11], %13 {strides = array<i32>} : memref<4x128x128xbf16, #tpu.memory_space<vmem>>, vector<4x128x128xbf16>,
    return
  }
  func.func @transform_0(%arg0: i32) -> (i32, i32, i32) {
    %c0_i32 = arith.constant 0 : i32
    %c0_i32_0 = arith.constant 0 : i32
    %c0_i32_1 = arith.constant 0 : i32
    return %arg0, %c0_i32, %c0_i32_0 : i32, i32, i32
  }
  func.func @transform_1(%arg0: i32) -> (i32, i32, i32) {
    %c0_i32 = arith.constant 0 : i32
    %c0_i32_0 = arith.constant 0 : i32
    %c0_i32_1 = arith.constant 0 : i32
    %c0_i32_2 = arith.constant 0 : i32
    return %c0_i32, %c0_i32_0, %c0_i32_1 : i32, i32, i32
  }
  func.func @transform_2(%arg0: i32) -> (i32, i32, i32) {
    %c0_i32 = arith.constant 0 : i32
    %c0_i32_0 = arith.constant 0 : i32
    %c0_i32_1 = arith.constant 0 : i32
    %c0_i32_2 = arith.constant 0 : i32
    return %c0_i32, %c0_i32_0, %c0_i32_1 : i32, i32, i32
  }
  func.func @transform_3(%arg0: i32) -> (i32, i32, i32) {
    %c0_i32 = arith.constant 0 : i32
    %c0_i32_0 = arith.constant 0 : i32
    %c0_i32_1 = arith.constant 0 : i32
    return %arg0, %c0_i32, %c0_i32_0 : i32, i32, i32
  }
}

module attributes {stable_mosaic.version = 11 : i64} {
  func.func @conv_stats_kernel(%arg0: i32, %arg1: memref<1x10x18x4xbf16, #tpu.memory_space<vmem>>, %arg2: memref<3x3x4x128xbf16, #tpu.memory_space<vmem>>, %arg3: memref<1x128x128xbf16, #tpu.memory_space<vmem>>, %arg4: memref<1x1x128xf32, #tpu.memory_space<vmem>>, %arg5: memref<1x1x128xf32, #tpu.memory_space<vmem>>) attributes {dimension_semantics = [#tpu.dimension_semantics<parallel>], iteration_bounds = array<i64: 4>, scalar_prefetch = 0 : i64, scratch_operands = 0 : i64, tpu.core_type = #tpu.core_type<tc>, window_params = [{transform_indices = @transform_0, window_bounds = array<i64: 1, 10, 18, 4>}, {pipeline_mode = #tpu.pipeline_mode<synchronous>, transform_indices = @transform_1, window_bounds = array<i64: 3, 3, 4, 128>}, {transform_indices = @transform_2, window_bounds = array<i64: 1, 128, 128>}, {transform_indices = @transform_3, window_bounds = array<i64: 1, 1, 128>}, {transform_indices = @transform_4, window_bounds = array<i64: 1, 1, 128>}]} {
    %c0 = arith.constant 0 : index
    %c0_0 = arith.constant 0 : index
    %c0_1 = arith.constant 0 : index
    %c0_2 = arith.constant 0 : index
    %0 = vector.load %arg1[%c0, %c0_0, %c0_1, %c0_2] : memref<1x10x18x4xbf16, #tpu.memory_space<vmem>>, vector<1x10x18x4xbf16>
    %1 = vector.shape_cast %0 : vector<1x10x18x4xbf16> to vector<10x18x4xbf16>
    %cst = arith.constant 0.000000e+00 : f32
    %2 = vector.broadcast %cst : f32 to vector<128x128xf32>
    %3 = vector.extract_strided_slice %1 {offsets = [0, 0, 0], sizes = [8, 16, 4], strides = [1, 1, 1]} : vector<10x18x4xbf16> to vector<8x16x4xbf16>
    %4 = vector.shape_cast %3 : vector<8x16x4xbf16> to vector<128x4xbf16>
    %c0_3 = arith.constant 0 : index
    %c0_4 = arith.constant 0 : index
    %c0_5 = arith.constant 0 : index
    %c0_6 = arith.constant 0 : index
    %5 = vector.load %arg2[%c0_3, %c0_4, %c0_5, %c0_6] : memref<3x3x4x128xbf16, #tpu.memory_space<vmem>>, vector<1x1x4x128xbf16>
    %6 = vector.shape_cast %5 : vector<1x1x4x128xbf16> to vector<4x128xbf16>
    %cst_7 = arith.constant dense<0.000000e+00> : vector<128x128xf32>
    %7 = tpu.matmul %4, %6, %cst_7 {dimension_numbers = #tpu.dot_dimension_numbers<[1], [0], [0], [1], [0, 0, 1, 1], [], []>} : vector<128x4xbf16>, vector<4x128xbf16>, vector<128x128xf32> -> vector<128x128xf32>
    %8 = arith.addf %2, %7 : vector<128x128xf32>
    %9 = vector.extract_strided_slice %1 {offsets = [0, 1, 0], sizes = [8, 16, 4], strides = [1, 1, 1]} : vector<10x18x4xbf16> to vector<8x16x4xbf16>
    %10 = vector.shape_cast %9 : vector<8x16x4xbf16> to vector<128x4xbf16>
    %c0_8 = arith.constant 0 : index
    %c1 = arith.constant 1 : index
    %c0_9 = arith.constant 0 : index
    %c0_10 = arith.constant 0 : index
    %11 = vector.load %arg2[%c0_8, %c1, %c0_9, %c0_10] : memref<3x3x4x128xbf16, #tpu.memory_space<vmem>>, vector<1x1x4x128xbf16>
    %12 = vector.shape_cast %11 : vector<1x1x4x128xbf16> to vector<4x128xbf16>
    %cst_11 = arith.constant dense<0.000000e+00> : vector<128x128xf32>
    %13 = tpu.matmul %10, %12, %cst_11 {dimension_numbers = #tpu.dot_dimension_numbers<[1], [0], [0], [1], [0, 0, 1, 1], [], []>} : vector<128x4xbf16>, vector<4x128xbf16>, vector<128x128xf32> -> vector<128x128xf32>
    %14 = arith.addf %8, %13 : vector<128x128xf32>
    %15 = vector.extract_strided_slice %1 {offsets = [0, 2, 0], sizes = [8, 16, 4], strides = [1, 1, 1]} : vector<10x18x4xbf16> to vector<8x16x4xbf16>
    %16 = vector.shape_cast %15 : vector<8x16x4xbf16> to vector<128x4xbf16>
    %c0_12 = arith.constant 0 : index
    %c2 = arith.constant 2 : index
    %c0_13 = arith.constant 0 : index
    %c0_14 = arith.constant 0 : index
    %17 = vector.load %arg2[%c0_12, %c2, %c0_13, %c0_14] : memref<3x3x4x128xbf16, #tpu.memory_space<vmem>>, vector<1x1x4x128xbf16>
    %18 = vector.shape_cast %17 : vector<1x1x4x128xbf16> to vector<4x128xbf16>
    %cst_15 = arith.constant dense<0.000000e+00> : vector<128x128xf32>
    %19 = tpu.matmul %16, %18, %cst_15 {dimension_numbers = #tpu.dot_dimension_numbers<[1], [0], [0], [1], [0, 0, 1, 1], [], []>} : vector<128x4xbf16>, vector<4x128xbf16>, vector<128x128xf32> -> vector<128x128xf32>
    %20 = arith.addf %14, %19 : vector<128x128xf32>
    %21 = vector.extract_strided_slice %1 {offsets = [1, 0, 0], sizes = [8, 16, 4], strides = [1, 1, 1]} : vector<10x18x4xbf16> to vector<8x16x4xbf16>
    %22 = vector.shape_cast %21 : vector<8x16x4xbf16> to vector<128x4xbf16>
    %c1_16 = arith.constant 1 : index
    %c0_17 = arith.constant 0 : index
    %c0_18 = arith.constant 0 : index
    %c0_19 = arith.constant 0 : index
    %23 = vector.load %arg2[%c1_16, %c0_17, %c0_18, %c0_19] : memref<3x3x4x128xbf16, #tpu.memory_space<vmem>>, vector<1x1x4x128xbf16>
    %24 = vector.shape_cast %23 : vector<1x1x4x128xbf16> to vector<4x128xbf16>
    %cst_20 = arith.constant dense<0.000000e+00> : vector<128x128xf32>
    %25 = tpu.matmul %22, %24, %cst_20 {dimension_numbers = #tpu.dot_dimension_numbers<[1], [0], [0], [1], [0, 0, 1, 1], [], []>} : vector<128x4xbf16>, vector<4x128xbf16>, vector<128x128xf32> -> vector<128x128xf32>
    %26 = arith.addf %20, %25 : vector<128x128xf32>
    %27 = vector.extract_strided_slice %1 {offsets = [1, 1, 0], sizes = [8, 16, 4], strides = [1, 1, 1]} : vector<10x18x4xbf16> to vector<8x16x4xbf16>
    %28 = vector.shape_cast %27 : vector<8x16x4xbf16> to vector<128x4xbf16>
    %c1_21 = arith.constant 1 : index
    %c1_22 = arith.constant 1 : index
    %c0_23 = arith.constant 0 : index
    %c0_24 = arith.constant 0 : index
    %29 = vector.load %arg2[%c1_21, %c1_22, %c0_23, %c0_24] : memref<3x3x4x128xbf16, #tpu.memory_space<vmem>>, vector<1x1x4x128xbf16>
    %30 = vector.shape_cast %29 : vector<1x1x4x128xbf16> to vector<4x128xbf16>
    %cst_25 = arith.constant dense<0.000000e+00> : vector<128x128xf32>
    %31 = tpu.matmul %28, %30, %cst_25 {dimension_numbers = #tpu.dot_dimension_numbers<[1], [0], [0], [1], [0, 0, 1, 1], [], []>} : vector<128x4xbf16>, vector<4x128xbf16>, vector<128x128xf32> -> vector<128x128xf32>
    %32 = arith.addf %26, %31 : vector<128x128xf32>
    %33 = vector.extract_strided_slice %1 {offsets = [1, 2, 0], sizes = [8, 16, 4], strides = [1, 1, 1]} : vector<10x18x4xbf16> to vector<8x16x4xbf16>
    %34 = vector.shape_cast %33 : vector<8x16x4xbf16> to vector<128x4xbf16>
    %c1_26 = arith.constant 1 : index
    %c2_27 = arith.constant 2 : index
    %c0_28 = arith.constant 0 : index
    %c0_29 = arith.constant 0 : index
    %35 = vector.load %arg2[%c1_26, %c2_27, %c0_28, %c0_29] : memref<3x3x4x128xbf16, #tpu.memory_space<vmem>>, vector<1x1x4x128xbf16>
    %36 = vector.shape_cast %35 : vector<1x1x4x128xbf16> to vector<4x128xbf16>
    %cst_30 = arith.constant dense<0.000000e+00> : vector<128x128xf32>
    %37 = tpu.matmul %34, %36, %cst_30 {dimension_numbers = #tpu.dot_dimension_numbers<[1], [0], [0], [1], [0, 0, 1, 1], [], []>} : vector<128x4xbf16>, vector<4x128xbf16>, vector<128x128xf32> -> vector<128x128xf32>
    %38 = arith.addf %32, %37 : vector<128x128xf32>
    %39 = vector.extract_strided_slice %1 {offsets = [2, 0, 0], sizes = [8, 16, 4], strides = [1, 1, 1]} : vector<10x18x4xbf16> to vector<8x16x4xbf16>
    %40 = vector.shape_cast %39 : vector<8x16x4xbf16> to vector<128x4xbf16>
    %c2_31 = arith.constant 2 : index
    %c0_32 = arith.constant 0 : index
    %c0_33 = arith.constant 0 : index
    %c0_34 = arith.constant 0 : index
    %41 = vector.load %arg2[%c2_31, %c0_32, %c0_33, %c0_34] : memref<3x3x4x128xbf16, #tpu.memory_space<vmem>>, vector<1x1x4x128xbf16>
    %42 = vector.shape_cast %41 : vector<1x1x4x128xbf16> to vector<4x128xbf16>
    %cst_35 = arith.constant dense<0.000000e+00> : vector<128x128xf32>
    %43 = tpu.matmul %40, %42, %cst_35 {dimension_numbers = #tpu.dot_dimension_numbers<[1], [0], [0], [1], [0, 0, 1, 1], [], []>} : vector<128x4xbf16>, vector<4x128xbf16>, vector<128x128xf32> -> vector<128x128xf32>
    %44 = arith.addf %38, %43 : vector<128x128xf32>
    %45 = vector.extract_strided_slice %1 {offsets = [2, 1, 0], sizes = [8, 16, 4], strides = [1, 1, 1]} : vector<10x18x4xbf16> to vector<8x16x4xbf16>
    %46 = vector.shape_cast %45 : vector<8x16x4xbf16> to vector<128x4xbf16>
    %c2_36 = arith.constant 2 : index
    %c1_37 = arith.constant 1 : index
    %c0_38 = arith.constant 0 : index
    %c0_39 = arith.constant 0 : index
    %47 = vector.load %arg2[%c2_36, %c1_37, %c0_38, %c0_39] : memref<3x3x4x128xbf16, #tpu.memory_space<vmem>>, vector<1x1x4x128xbf16>
    %48 = vector.shape_cast %47 : vector<1x1x4x128xbf16> to vector<4x128xbf16>
    %cst_40 = arith.constant dense<0.000000e+00> : vector<128x128xf32>
    %49 = tpu.matmul %46, %48, %cst_40 {dimension_numbers = #tpu.dot_dimension_numbers<[1], [0], [0], [1], [0, 0, 1, 1], [], []>} : vector<128x4xbf16>, vector<4x128xbf16>, vector<128x128xf32> -> vector<128x128xf32>
    %50 = arith.addf %44, %49 : vector<128x128xf32>
    %51 = vector.extract_strided_slice %1 {offsets = [2, 2, 0], sizes = [8, 16, 4], strides = [1, 1, 1]} : vector<10x18x4xbf16> to vector<8x16x4xbf16>
    %52 = vector.shape_cast %51 : vector<8x16x4xbf16> to vector<128x4xbf16>
    %c2_41 = arith.constant 2 : index
    %c2_42 = arith.constant 2 : index
    %c0_43 = arith.constant 0 : index
    %c0_44 = arith.constant 0 : index
    %53 = vector.load %arg2[%c2_41, %c2_42, %c0_43, %c0_44] : memref<3x3x4x128xbf16, #tpu.memory_space<vmem>>, vector<1x1x4x128xbf16>
    %54 = vector.shape_cast %53 : vector<1x1x4x128xbf16> to vector<4x128xbf16>
    %cst_45 = arith.constant dense<0.000000e+00> : vector<128x128xf32>
    %55 = tpu.matmul %52, %54, %cst_45 {dimension_numbers = #tpu.dot_dimension_numbers<[1], [0], [0], [1], [0, 0, 1, 1], [], []>} : vector<128x4xbf16>, vector<4x128xbf16>, vector<128x128xf32> -> vector<128x128xf32>
    %56 = arith.addf %50, %55 : vector<128x128xf32>
    %57 = arith.truncf %56 : vector<128x128xf32> to vector<128x128xbf16>
    %c0_46 = arith.constant 0 : index
    %c0_47 = arith.constant 0 : index
    %c0_48 = arith.constant 0 : index
    %58 = vector.load %arg3[%c0_46, %c0_47, %c0_48] : memref<1x128x128xbf16, #tpu.memory_space<vmem>>, vector<1x128x128xbf16>
    %59 = vector.shape_cast %58 : vector<1x128x128xbf16> to vector<128x128xbf16>
    %60 = vector.shape_cast %57 : vector<128x128xbf16> to vector<1x128x128xbf16>
    tpu.vector_store %arg3[%c0_46, %c0_47, %c0_48], %60 {strides = array<i32>} : memref<1x128x128xbf16, #tpu.memory_space<vmem>>, vector<1x128x128xbf16>,
    %cst_49 = arith.constant dense<0.000000e+00> : vector<128xf32>
    %61 = vector.multi_reduction <add>, %56, %cst_49 [0] : vector<128x128xf32> to vector<128xf32>
    %62 = vector.shape_cast %61 : vector<128xf32> to vector<1x128xf32>
    %c0_50 = arith.constant 0 : index
    %c0_51 = arith.constant 0 : index
    %c0_52 = arith.constant 0 : index
    %63 = vector.load %arg4[%c0_50, %c0_51, %c0_52] : memref<1x1x128xf32, #tpu.memory_space<vmem>>, vector<1x1x128xf32>
    %64 = vector.shape_cast %63 : vector<1x1x128xf32> to vector<1x128xf32>
    %65 = vector.shape_cast %62 : vector<1x128xf32> to vector<1x1x128xf32>
    tpu.vector_store %arg4[%c0_50, %c0_51, %c0_52], %65 {strides = array<i32>} : memref<1x1x128xf32, #tpu.memory_space<vmem>>, vector<1x1x128xf32>,
    %66 = arith.mulf %56, %56 : vector<128x128xf32>
    %cst_53 = arith.constant dense<0.000000e+00> : vector<128xf32>
    %67 = vector.multi_reduction <add>, %66, %cst_53 [0] : vector<128x128xf32> to vector<128xf32>
    %68 = vector.shape_cast %67 : vector<128xf32> to vector<1x128xf32>
    %c0_54 = arith.constant 0 : index
    %c0_55 = arith.constant 0 : index
    %c0_56 = arith.constant 0 : index
    %69 = vector.load %arg5[%c0_54, %c0_55, %c0_56] : memref<1x1x128xf32, #tpu.memory_space<vmem>>, vector<1x1x128xf32>
    %70 = vector.shape_cast %69 : vector<1x1x128xf32> to vector<1x128xf32>
    %71 = vector.shape_cast %68 : vector<1x128xf32> to vector<1x1x128xf32>
    tpu.vector_store %arg5[%c0_54, %c0_55, %c0_56], %71 {strides = array<i32>} : memref<1x1x128xf32, #tpu.memory_space<vmem>>, vector<1x1x128xf32>,
    return
  }
  func.func @transform_0(%arg0: i32) -> (i32, i32, i32, i32) {
    %c0_i32 = arith.constant 0 : i32
    %c0_i32_0 = arith.constant 0 : i32
    %c0_i32_1 = arith.constant 0 : i32
    %c0_i32_2 = arith.constant 0 : i32
    return %arg0, %c0_i32, %c0_i32_0, %c0_i32_1 : i32, i32, i32, i32
  }
  func.func @transform_1(%arg0: i32) -> (i32, i32, i32, i32) {
    %c0_i32 = arith.constant 0 : i32
    %c0_i32_0 = arith.constant 0 : i32
    %c0_i32_1 = arith.constant 0 : i32
    %c0_i32_2 = arith.constant 0 : i32
    %c0_i32_3 = arith.constant 0 : i32
    return %c0_i32, %c0_i32_0, %c0_i32_1, %c0_i32_2 : i32, i32, i32, i32
  }
  func.func @transform_2(%arg0: i32) -> (i32, i32, i32) {
    %c0_i32 = arith.constant 0 : i32
    %c0_i32_0 = arith.constant 0 : i32
    %c0_i32_1 = arith.constant 0 : i32
    return %arg0, %c0_i32, %c0_i32_0 : i32, i32, i32
  }
  func.func @transform_3(%arg0: i32) -> (i32, i32, i32) {
    %c0_i32 = arith.constant 0 : i32
    %c0_i32_0 = arith.constant 0 : i32
    %c0_i32_1 = arith.constant 0 : i32
    return %arg0, %c0_i32, %c0_i32_0 : i32, i32, i32
  }
  func.func @transform_4(%arg0: i32) -> (i32, i32, i32) {
    %c0_i32 = arith.constant 0 : i32
    %c0_i32_0 = arith.constant 0 : i32
    %c0_i32_1 = arith.constant 0 : i32
    return %arg0, %c0_i32, %c0_i32_0 : i32, i32, i32
  }
}

</mosaic_0001>

<bundles_post_ra>
// kernel: cnn_block_forward.3
= control target key start
LH: loop header
LB: loop body
LE: loop exit
PB: predicated region body
PF: predicated region fallthrough
CT: control target
= control target key end

     0   :  { %s1631_s0 = inlined_call_operand.vmem [shape: bf16[4,128,128], index: 0, kind: input, shape index: {}, may-alias: {0,3}]   ;;  %s1632_s1 = inlined_call_operand.vmem [shape: f32[1,1,128], index: 1, kind: input, shape index: {}]   ;;  %s1633_s2 = inlined_call_operand.vmem [shape: f32[1,1,128], index: 2, kind: input, shape index: {}]   ;;  %s1634_s3 = inlined_call_operand.vmem [shape: bf16[4,128,128], index: 3, kind: output, shape index: {}, may-alias: {0,3}]  }
   0x1   :  { %v931_v0 = vld [vmem:[%s1631_s0] sm:$0xff]   ;;  %v1218_v4 = vld [vmem:[%s1631_s0 + $0x8] sm:$0xff]   ;;  %v1219_v5 = vld [vmem:[%s1631_s0 + $0x10] sm:$0xff]  }
   0x2   :  { %v1306_v1 = vld [vmem:[%s1632_s1] ss:$0 sm:$0xff]  ;;  %v932_v2 = vunpack.c.l.bf16 %v931_v0  ;;  %v933_v3 = vunpack.c.h.bf16 %v931_v0  ;;  %v1220_v6 = vld [vmem:[%s1631_s0 + $0x18] sm:$0xff]   ;;  %v936_v8 = vunpack.c.l.bf16 %v1218_v4  ;;  %v937_v9 = vunpack.c.h.bf16 %v1218_v4  ;;  %v1222_v35 = vld [vmem:[%s1631_s0 + $0x28] sm:$0xff]  }
   0x3   :  { %v1320_v7 = vld [vmem:[%s1633_s2] ss:$0 sm:$0xff]  ;;  %v940_v10 = vunpack.c.l.bf16 %v1219_v5  ;;  %v941_v11 = vunpack.c.h.bf16 %v1219_v5  ;;  %v944_v14 = vunpack.c.l.bf16 %v1220_v6  ;;  %v945_v15 = vunpack.c.h.bf16 %v1220_v6 }
   0x4   :  { %v149_v12 = vmul.f32 %v932_v2, %v1306_v1  ;;  %v150_v13 = vmul.f32 %v933_v3, %v1306_v1  ;;  %v151_v16 = vmul.f32 %v936_v8, %v1306_v1  ;;  %v152_v17 = vmul.f32 %v937_v9, %v1306_v1  ;;  %v1221_v34 = vld [vmem:[%s1631_s0 + $0x20] sm:$0xff]  }
   0x5   :  { %v153_v18 = vmul.f32 %v940_v10, %v1306_v1  ;;  %v154_v19 = vmul.f32 %v941_v11, %v1306_v1  ;;  %v155_v22 = vmul.f32 %v944_v14, %v1306_v1  ;;  %v156_v23 = vmul.f32 %v945_v15, %v1306_v1 }
   0x6   :  { %v220_v20 = vadd.f32 %v1320_v7, %v149_v12  ;;  %v221_v21 = vadd.f32 %v1320_v7, %v150_v13  ;;  %v222_v24 = vadd.f32 %v1320_v7, %v151_v16  ;;  %v223_v25 = vadd.f32 %v1320_v7, %v152_v17 }
   0x7   :  { %v224_v26 = vadd.f32 %v1320_v7, %v153_v18  ;;  %v225_v27 = vadd.f32 %v1320_v7, %v154_v19  ;;  %v226_v42 = vadd.f32 %v1320_v7, %v155_v22  ;;  %v227_v43 = vadd.f32 %v1320_v7, %v156_v23 }
   0x8   :  { %vm284_vm0 = vcmp.gt.f32.partialorder %v220_v20, 0.0  ;;  %vm285_vm1 = vcmp.gt.f32.partialorder %v221_v21, 0.0  ;;  %v348_v28 = vmul.f32 0.1, %v220_v20  ;;  %v349_v29 = vmul.f32 0.1, %v221_v21 }
   0x9   :  { %vm286_vm2 = vcmp.gt.f32.partialorder %v222_v24, 0.0  ;;  %vm287_vm3 = vcmp.gt.f32.partialorder %v223_v25, 0.0  ;;  %v350_v30 = vmul.f32 0.1, %v222_v24  ;;  %v351_v31 = vmul.f32 0.1, %v223_v25 }
   0xa   :  { %v412_v32 = vsel %vm284_vm0, %v220_v20, %v348_v28  ;;  %v413_v33 = vsel %vm285_vm1, %v221_v21, %v349_v29  ;;  %vm288_vm4 = vcmp.gt.f32.partialorder %v224_v26, 0.0  ;;  %vm289_vm5 = vcmp.gt.f32.partialorder %v225_v27, 0.0 }
   0xb   :  { %v1061_v36 = vpack.c.bf16 %v413_v33, %v412_v32  ;;  %v414_v37 = vsel %vm286_vm2, %v222_v24, %v350_v30  ;;  %v415_v38 = vsel %vm287_vm3, %v223_v25, %v351_v31  ;;  %v352_v39 = vmul.f32 0.1, %v224_v26 }
   0xc   :  { %v1066_v40 = vpack.c.bf16 %v415_v38, %v414_v37  ;;  %v353_v41 = vmul.f32 0.1, %v225_v27  ;;  %v948_v45 = vunpack.c.l.bf16 %v1221_v34  ;;  %v949_v46 = vunpack.c.h.bf16 %v1221_v34 }
   0xd   :  { %1062 = vst [vmem:[%s1634_s3] sm:$0xff] %v1061_v36   ;;  %v416_v44 = vsel %vm288_vm4, %v224_v26, %v352_v39  ;;  %v952_v47 = vunpack.c.l.bf16 %v1222_v35  ;;  %vm290_vm6 = vcmp.gt.f32.partialorder %v226_v42, 0.0  ;;  %vm291_vm7 = vcmp.gt.f32.partialorder %v227_v43, 0.0 }
   0xe   :  { %v417_v49 = vsel %vm289_vm5, %v225_v27, %v353_v41  ;;  %v354_v50 = vmul.f32 0.1, %v226_v42  ;;  %v355_v52 = vmul.f32 0.1, %v227_v43  ;;  %v157_v53 = vmul.f32 %v948_v45, %v1306_v1 }
   0xf   :  { %v1071_v51 = vpack.c.bf16 %v417_v49, %v416_v44  ;;  %v158_v54 = vmul.f32 %v949_v46, %v1306_v1  ;;  %v953_v56 = vunpack.c.h.bf16 %v1222_v35  ;;  %v159_v57 = vmul.f32 %v952_v47, %v1306_v1 }
  0x10   :  { %v418_v55 = vsel %vm290_vm6, %v226_v42, %v354_v50  ;;  %v419_v59 = vsel %vm291_vm7, %v227_v43, %v355_v52  ;;  %v228_v60 = vadd.f32 %v1320_v7, %v157_v53 }
  0x11   :  { %v229_v61 = vadd.f32 %v1320_v7, %v158_v54  ;;  %v1076_v63 = vpack.c.bf16 %v419_v59, %v418_v55  ;;  %v160_v0 = vmul.f32 %v953_v56, %v1306_v1  ;;  %v230_v2 = vadd.f32 %v1320_v7, %v159_v57 }
  0x12   :  { %vm292_vm8 = vcmp.gt.f32.partialorder %v228_v60, 0.0  ;;  %v356_v5 = vmul.f32 0.1, %v228_v60 }
  0x13   :  { %vm293_vm9 = vcmp.gt.f32.partialorder %v229_v61, 0.0  ;;  %v357_v6 = vmul.f32 0.1, %v229_v61  ;;  %v231_v8 = vadd.f32 %v1320_v7, %v160_v0  ;;  %vm294_vm10 = vcmp.gt.f32.partialorder %v230_v2, 0.0 }
  0x14   :  { %v1223_v48 = vld [vmem:[%s1631_s0 + $0x30] sm:$0xff]   ;;  %v358_v9 = vmul.f32 0.1, %v230_v2  ;;  %v420_v11 = vsel %vm292_vm8, %v228_v60, %v356_v5 }
  0x15   :  { %1249 = vst [vmem:[%s1634_s3 + $0x8] sm:$0xff] %v1066_v40   ;;  %v956_v58 = vunpack.c.l.bf16 %v1223_v48  ;;  %1250 = vst [vmem:[%s1634_s3 + $0x10] sm:$0xff] %v1071_v51   ;;  %v957_v62 = vunpack.c.h.bf16 %v1223_v48  ;;  %v421_v12 = vsel %vm293_vm9, %v229_v61, %v357_v6  ;;  %vm295_vm11 = vcmp.gt.f32.partialorder %v231_v8, 0.0 }
  0x16   :  { %v1081_v16 = vpack.c.bf16 %v421_v12, %v420_v11  ;;  %v359_v17 = vmul.f32 0.1, %v231_v8  ;;  %v422_v18 = vsel %vm294_vm10, %v230_v2, %v358_v9 }
  0x17   :  { %v161_v3 = vmul.f32 %v956_v58, %v1306_v1  ;;  %v162_v10 = vmul.f32 %v957_v62, %v1306_v1 }
  0x18   :  { %v423_v22 = vsel %vm295_vm11, %v231_v8, %v359_v17 }
  0x19   :  { %v232_v13 = vadd.f32 %v1320_v7, %v161_v3  ;;  %v233_v19 = vadd.f32 %v1320_v7, %v162_v10  ;;  %v1086_v28 = vpack.c.bf16 %v423_v22, %v422_v18 }
  0x1b   :  { %vm296_vm12 = vcmp.gt.f32.partialorder %v232_v13, 0.0  ;;  %v360_v20 = vmul.f32 0.1, %v232_v13  ;;  %vm297_vm13 = vcmp.gt.f32.partialorder %v233_v19, 0.0  ;;  %v361_v29 = vmul.f32 0.1, %v233_v19 }
  0x1c   :  { %v1224_v4 = vld [vmem:[%s1631_s0 + $0x38] sm:$0xff]  }
  0x1d   :  { %1251 = vst [vmem:[%s1634_s3 + $0x18] sm:$0xff] %v1076_v63   ;;  %v960_v14 = vunpack.c.l.bf16 %v1224_v4  ;;  %v961_v21 = vunpack.c.h.bf16 %v1224_v4  ;;  %v424_v30 = vsel %vm296_vm12, %v232_v13, %v360_v20  ;;  %v425_v35 = vsel %vm297_vm13, %v233_v19, %v361_v29 }
  0x1e   :  { %v1091_v39 = vpack.c.bf16 %v425_v35, %v424_v30 }
  0x1f   :  { %v163_v23 = vmul.f32 %v960_v14, %v1306_v1  ;;  %v164_v31 = vmul.f32 %v961_v21, %v1306_v1 }
  0x21   :  { %v234_v32 = vadd.f32 %v1320_v7, %v163_v23  ;;  %v235_v40 = vadd.f32 %v1320_v7, %v164_v31 }
  0x23   :  { %vm298_vm14 = vcmp.gt.f32.partialorder %v234_v32, 0.0  ;;  %v362_v41 = vmul.f32 0.1, %v234_v32  ;;  %vm299_vm15 = vcmp.gt.f32.partialorder %v235_v40, 0.0  ;;  %v363_v46 = vmul.f32 0.1, %v235_v40 }
  0x24   :  { %v1225_v15 = vld [vmem:[%s1631_s0 + $0x40] sm:$0xff]  }
  0x25   :  { %1252 = vst [vmem:[%s1634_s3 + $0x20] sm:$0xff] %v1081_v16   ;;  %v964_v24 = vunpack.c.l.bf16 %v1225_v15  ;;  %v965_v25 = vunpack.c.h.bf16 %v1225_v15  ;;  %v426_v47 = vsel %vm298_vm14, %v234_v32, %v362_v41  ;;  %v427_v51 = vsel %vm299_vm15, %v235_v40, %v363_v46 }
  0x26   :  { %v1096_v56 = vpack.c.bf16 %v427_v51, %v426_v47 }
  0x27   :  { %v165_v33 = vmul.f32 %v964_v24, %v1306_v1  ;;  %v166_v34 = vmul.f32 %v965_v25, %v1306_v1 }
  0x29   :  { %v236_v42 = vadd.f32 %v1320_v7, %v165_v33  ;;  %v237_v43 = vadd.f32 %v1320_v7, %v166_v34 }
  0x2b   :  { %vm300_vm0 = vcmp.gt.f32.partialorder %v236_v42, 0.0  ;;  %vm301_vm1 = vcmp.gt.f32.partialorder %v237_v43, 0.0  ;;  %v364_v49 = vmul.f32 0.1, %v236_v42  ;;  %v365_v50 = vmul.f32 0.1, %v237_v43 }
  0x2c   :  { %v1226_v26 = vld [vmem:[%s1631_s0 + $0x48] sm:$0xff]   ;;  %v1227_v27 = vld [vmem:[%s1631_s0 + $0x50] sm:$0xff]  }
  0x2d   :  { %1253 = vst [vmem:[%s1634_s3 + $0x28] sm:$0xff] %v1086_v28   ;;  %v968_v36 = vunpack.c.l.bf16 %v1226_v26  ;;  %v969_v37 = vunpack.c.h.bf16 %v1226_v26  ;;  %v972_v38 = vunpack.c.l.bf16 %v1227_v27  ;;  %1254 = vst [vmem:[%s1634_s3 + $0x30] sm:$0xff] %v1091_v39   ;;  %v973_v48 = vunpack.c.h.bf16 %v1227_v27 }
  0x2e   :  { %v428_v57 = vsel %vm300_vm0, %v236_v42, %v364_v49  ;;  %v429_v58 = vsel %vm301_vm1, %v237_v43, %v365_v50 }
  0x2f   :  { %v167_v44 = vmul.f32 %v968_v36, %v1306_v1  ;;  %v168_v45 = vmul.f32 %v969_v37, %v1306_v1  ;;  %v169_v54 = vmul.f32 %v972_v38, %v1306_v1  ;;  %v170_v59 = vmul.f32 %v973_v48, %v1306_v1 }
  0x30   :  { %v1101_v61 = vpack.c.bf16 %v429_v58, %v428_v57 }
  0x31   :  { %v238_v52 = vadd.f32 %v1320_v7, %v167_v44  ;;  %v239_v53 = vadd.f32 %v1320_v7, %v168_v45  ;;  %v240_v0 = vadd.f32 %v1320_v7, %v169_v54  ;;  %v241_v2 = vadd.f32 %v1320_v7, %v170_v59 }
  0x33   :  { %vm302_vm2 = vcmp.gt.f32.partialorder %v238_v52, 0.0  ;;  %vm303_vm3 = vcmp.gt.f32.partialorder %v239_v53, 0.0  ;;  %v366_v62 = vmul.f32 0.1, %v238_v52  ;;  %v367_v63 = vmul.f32 0.1, %v239_v53 }
  0x34   :  { %v1228_v55 = vld [vmem:[%s1631_s0 + $0x58] sm:$0xff]   ;;  %v1229_v60 = vld [vmem:[%s1631_s0 + $0x60] sm:$0xff]   ;;  %vm304_vm4 = vcmp.gt.f32.partialorder %v240_v0, 0.0  ;;  %vm305_vm5 = vcmp.gt.f32.partialorder %v241_v2, 0.0  ;;  %v368_v11 = vmul.f32 0.1, %v240_v0 }
  0x35   :  { %1255 = vst [vmem:[%s1634_s3 + $0x38] sm:$0xff] %v1096_v56   ;;  %v976_v3 = vunpack.c.l.bf16 %v1228_v55  ;;  %1256 = vst [vmem:[%s1634_s3 + $0x40] sm:$0xff] %v1101_v61   ;;  %v430_v4 = vsel %vm302_vm2, %v238_v52, %v366_v62  ;;  %v977_v5 = vunpack.c.h.bf16 %v1228_v55  ;;  %v980_v6 = vunpack.c.l.bf16 %v1229_v60 }
  0x36   :  { %v981_v8 = vunpack.c.h.bf16 %v1229_v60  ;;  %v431_v10 = vsel %vm303_vm3, %v239_v53, %v367_v63  ;;  %v369_v13 = vmul.f32 0.1, %v241_v2  ;;  %v432_v16 = vsel %vm304_vm4, %v240_v0, %v368_v11 }
  0x37   :  { %v1106_v12 = vpack.c.bf16 %v431_v10, %v430_v4  ;;  %v171_v14 = vmul.f32 %v976_v3, %v1306_v1  ;;  %v172_v15 = vmul.f32 %v977_v5, %v1306_v1  ;;  %v173_v17 = vmul.f32 %v980_v6, %v1306_v1 }
  0x38   :  { %v174_v18 = vmul.f32 %v981_v8, %v1306_v1  ;;  %v433_v20 = vsel %vm305_vm5, %v241_v2, %v369_v13 }
  0x39   :  { %v242_v21 = vadd.f32 %v1320_v7, %v171_v14  ;;  %v243_v22 = vadd.f32 %v1320_v7, %v172_v15  ;;  %v1111_v24 = vpack.c.bf16 %v433_v20, %v432_v16  ;;  %v244_v25 = vadd.f32 %v1320_v7, %v173_v17 }
  0x3a   :  { %v245_v26 = vadd.f32 %v1320_v7, %v174_v18 }
  0x3b   :  { %vm306_vm6 = vcmp.gt.f32.partialorder %v242_v21, 0.0  ;;  %vm307_vm7 = vcmp.gt.f32.partialorder %v243_v22, 0.0  ;;  %v370_v29 = vmul.f32 0.1, %v242_v21  ;;  %v371_v30 = vmul.f32 0.1, %v243_v22 }
  0x3c   :  { %v1230_v9 = vld [vmem:[%s1631_s0 + $0x68] sm:$0xff]   ;;  %vm308_vm8 = vcmp.gt.f32.partialorder %v244_v25, 0.0  ;;  %vm309_vm9 = vcmp.gt.f32.partialorder %v245_v26, 0.0  ;;  %v372_v31 = vmul.f32 0.1, %v244_v25 }
  0x3d   :  { %v984_v19 = vunpack.c.l.bf16 %v1230_v9  ;;  %1257 = vst [vmem:[%s1634_s3 + $0x48] sm:$0xff] %v1106_v12   ;;  %v985_v23 = vunpack.c.h.bf16 %v1230_v9  ;;  %v373_v32 = vmul.f32 0.1, %v245_v26  ;;  %v434_v33 = vsel %vm306_vm6, %v242_v21, %v370_v29 }
  0x3e   :  { %v435_v34 = vsel %vm307_vm7, %v243_v22, %v371_v30  ;;  %v436_v39 = vsel %vm308_vm8, %v244_v25, %v372_v31 }
  0x3f   :  { %v175_v27 = vmul.f32 %v984_v19, %v1306_v1  ;;  %v176_v35 = vmul.f32 %v985_v23, %v1306_v1  ;;  %v1116_v38 = vpack.c.bf16 %v435_v34, %v434_v33  ;;  %v437_v40 = vsel %vm309_vm9, %v245_v26, %v373_v32 }
  0x40   :  { %v1121_v43 = vpack.c.bf16 %v437_v40, %v436_v39 }
  0x41   :  { %v246_v36 = vadd.f32 %v1320_v7, %v175_v27  ;;  %v247_v44 = vadd.f32 %v1320_v7, %v176_v35 }
  0x43   :  { %vm310_vm10 = vcmp.gt.f32.partialorder %v246_v36, 0.0  ;;  %v374_v45 = vmul.f32 0.1, %v246_v36  ;;  %vm311_vm11 = vcmp.gt.f32.partialorder %v247_v44, 0.0  ;;  %v375_v51 = vmul.f32 0.1, %v247_v44 }
  0x44   :  { %v1231_v28 = vld [vmem:[%s1631_s0 + $0x70] sm:$0xff]  }
  0x45   :  { %1258 = vst [vmem:[%s1634_s3 + $0x50] sm:$0xff] %v1111_v24   ;;  %v988_v41 = vunpack.c.l.bf16 %v1231_v28  ;;  %v989_v46 = vunpack.c.h.bf16 %v1231_v28  ;;  %v438_v52 = vsel %vm310_vm10, %v246_v36, %v374_v45  ;;  %v439_v58 = vsel %vm311_vm11, %v247_v44, %v375_v51 }
  0x46   :  { %v1126_v62 = vpack.c.bf16 %v439_v58, %v438_v52 }
  0x47   :  { %v177_v47 = vmul.f32 %v988_v41, %v1306_v1  ;;  %v178_v54 = vmul.f32 %v989_v46, %v1306_v1 }
  0x49   :  { %v248_v55 = vadd.f32 %v1320_v7, %v177_v47  ;;  %v249_v63 = vadd.f32 %v1320_v7, %v178_v54 }
  0x4b   :  { %vm312_vm12 = vcmp.gt.f32.partialorder %v248_v55, 0.0  ;;  %v376_v0 = vmul.f32 0.1, %v248_v55  ;;  %vm313_vm13 = vcmp.gt.f32.partialorder %v249_v63, 0.0  ;;  %v377_v6 = vmul.f32 0.1, %v249_v63 }
  0x4c   :  { %v1232_v37 = vld [vmem:[%s1631_s0 + $0x78] sm:$0xff]   ;;  %v1233_v42 = vld [vmem:[%s1631_s0 + $0x80] sm:$0xff]  }
  0x4d   :  { %1259 = vst [vmem:[%s1634_s3 + $0x58] sm:$0xff] %v1116_v38   ;;  %v992_v48 = vunpack.c.l.bf16 %v1232_v37  ;;  %v993_v49 = vunpack.c.h.bf16 %v1232_v37  ;;  %v996_v53 = vunpack.c.l.bf16 %v1233_v42  ;;  %v997_v59 = vunpack.c.h.bf16 %v1233_v42 }
  0x4e   :  { %v440_v8 = vsel %vm312_vm12, %v248_v55, %v376_v0  ;;  %v441_v12 = vsel %vm313_vm13, %v249_v63, %v377_v6 }
  0x4f   :  { %v179_v56 = vmul.f32 %v992_v48, %v1306_v1  ;;  %v180_v57 = vmul.f32 %v993_v49, %v1306_v1  ;;  %v181_v60 = vmul.f32 %v996_v53, %v1306_v1  ;;  %v182_v4 = vmul.f32 %v997_v59, %v1306_v1 }
  0x50   :  { %v1131_v16 = vpack.c.bf16 %v441_v12, %v440_v8 }
  0x51   :  { %v250_v2 = vadd.f32 %v1320_v7, %v179_v56  ;;  %v251_v3 = vadd.f32 %v1320_v7, %v180_v57  ;;  %v252_v5 = vadd.f32 %v1320_v7, %v181_v60  ;;  %v253_v13 = vadd.f32 %v1320_v7, %v182_v4 }
  0x53   :  { %vm314_vm14 = vcmp.gt.f32.partialorder %v250_v2, 0.0  ;;  %vm315_vm15 = vcmp.gt.f32.partialorder %v251_v3, 0.0  ;;  %v378_v10 = vmul.f32 0.1, %v250_v2  ;;  %v379_v11 = vmul.f32 0.1, %v251_v3 }
  0x54   :  { %v1234_v50 = vld [vmem:[%s1631_s0 + $0x88] sm:$0xff]   ;;  %vm316_vm0 = vcmp.gt.f32.partialorder %v252_v5, 0.0  ;;  %v380_v14 = vmul.f32 0.1, %v252_v5  ;;  %vm317_vm1 = vcmp.gt.f32.partialorder %v253_v13, 0.0 }
  0x55   :  { %1260 = vst [vmem:[%s1634_s3 + $0x60] sm:$0xff] %v1121_v43   ;;  %v1000_v61 = vunpack.c.l.bf16 %v1234_v50  ;;  %1261 = vst [vmem:[%s1634_s3 + $0x68] sm:$0xff] %v1126_v62   ;;  %v1001_v9 = vunpack.c.h.bf16 %v1234_v50  ;;  %v442_v17 = vsel %vm314_vm14, %v250_v2, %v378_v10  ;;  %v443_v18 = vsel %vm315_vm15, %v251_v3, %v379_v11 }
  0x56   :  { %v1136_v22 = vpack.c.bf16 %v443_v18, %v442_v17  ;;  %v381_v23 = vmul.f32 0.1, %v253_v13  ;;  %v444_v24 = vsel %vm316_vm0, %v252_v5, %v380_v14 }
  0x57   :  { %v183_v19 = vmul.f32 %v1000_v61, %v1306_v1  ;;  %v184_v25 = vmul.f32 %v1001_v9, %v1306_v1 }
  0x58   :  { %v445_v29 = vsel %vm317_vm1, %v253_v13, %v381_v23 }
  0x59   :  { %v254_v26 = vadd.f32 %v1320_v7, %v183_v19  ;;  %v1141_v33 = vpack.c.bf16 %v445_v29, %v444_v24  ;;  %v255_v34 = vadd.f32 %v1320_v7, %v184_v25 }
  0x5b   :  { %vm318_vm2 = vcmp.gt.f32.partialorder %v254_v26, 0.0  ;;  %v382_v35 = vmul.f32 0.1, %v254_v26  ;;  %vm319_vm3 = vcmp.gt.f32.partialorder %v255_v34, 0.0  ;;  %v383_v41 = vmul.f32 0.1, %v255_v34 }
  0x5c   :  { %v1235_v15 = vld [vmem:[%s1631_s0 + $0x90] sm:$0xff]   ;;  %v1236_v20 = vld [vmem:[%s1631_s0 + $0x98] sm:$0xff]   ;;  %v1237_v21 = vld [vmem:[%s1631_s0 + $0xa0] sm:$0xff]  }
  0x5d   :  { %1262 = vst [vmem:[%s1634_s3 + $0x70] sm:$0xff] %v1131_v16   ;;  %v1004_v27 = vunpack.c.l.bf16 %v1235_v15  ;;  %v1005_v28 = vunpack.c.h.bf16 %v1235_v15  ;;  %1263 = vst [vmem:[%s1634_s3 + $0x78] sm:$0xff] %v1136_v22   ;;  %v1008_v30 = vunpack.c.l.bf16 %v1236_v20  ;;  %v1009_v31 = vunpack.c.h.bf16 %v1236_v20 }
  0x5e   :  { %v1012_v32 = vunpack.c.l.bf16 %v1237_v21  ;;  %v446_v42 = vsel %vm318_vm2, %v254_v26, %v382_v35  ;;  %v1013_v43 = vunpack.c.h.bf16 %v1237_v21  ;;  %v447_v48 = vsel %vm319_vm3, %v255_v34, %v383_v41 }
  0x5f   :  { %v185_v36 = vmul.f32 %v1004_v27, %v1306_v1  ;;  %v186_v37 = vmul.f32 %v1005_v28, %v1306_v1  ;;  %v187_v38 = vmul.f32 %v1008_v30, %v1306_v1  ;;  %v188_v39 = vmul.f32 %v1009_v31, %v1306_v1 }
  0x60   :  { %v189_v49 = vmul.f32 %v1012_v32, %v1306_v1  ;;  %v190_v50 = vmul.f32 %v1013_v43, %v1306_v1  ;;  %v1146_v52 = vpack.c.bf16 %v447_v48, %v446_v42 }
  0x61   :  { %v256_v44 = vadd.f32 %v1320_v7, %v185_v36  ;;  %v257_v45 = vadd.f32 %v1320_v7, %v186_v37  ;;  %v258_v46 = vadd.f32 %v1320_v7, %v187_v38  ;;  %v259_v47 = vadd.f32 %v1320_v7, %v188_v39 }
  0x62   :  { %v260_v58 = vadd.f32 %v1320_v7, %v189_v49  ;;  %v261_v59 = vadd.f32 %v1320_v7, %v190_v50 }
  0x63   :  { %vm320_vm4 = vcmp.gt.f32.partialorder %v256_v44, 0.0  ;;  %vm321_vm5 = vcmp.gt.f32.partialorder %v257_v45, 0.0  ;;  %v384_v53 = vmul.f32 0.1, %v256_v44  ;;  %v385_v54 = vmul.f32 0.1, %v257_v45 }
  0x64   :  { %v1238_v40 = vld [vmem:[%s1631_s0 + $0xa8] sm:$0xff]   ;;  %vm322_vm6 = vcmp.gt.f32.partialorder %v258_v46, 0.0  ;;  %vm323_vm7 = vcmp.gt.f32.partialorder %v259_v47, 0.0  ;;  %v386_v55 = vmul.f32 0.1, %v258_v46  ;;  %vm324_vm8 = vcmp.gt.f32.partialorder %v260_v58, 0.0 }
  0x65   :  { %1264 = vst [vmem:[%s1634_s3 + $0x80] sm:$0xff] %v1141_v33   ;;  %v1016_v51 = vunpack.c.l.bf16 %v1238_v40  ;;  %1265 = vst [vmem:[%s1634_s3 + $0x88] sm:$0xff] %v1146_v52   ;;  %v448_v56 = vsel %vm320_vm4, %v256_v44, %v384_v53  ;;  %v387_v57 = vmul.f32 0.1, %v259_v47  ;;  %v449_v60 = vsel %vm321_vm5, %v257_v45, %v385_v54 }
  0x66   :  { %v450_v61 = vsel %vm322_vm6, %v258_v46, %v386_v55  ;;  %v1017_v62 = vunpack.c.h.bf16 %v1238_v40  ;;  %v1151_v3 = vpack.c.bf16 %v449_v60, %v448_v56  ;;  %vm325_vm9 = vcmp.gt.f32.partialorder %v261_v59, 0.0 }
  0x67   :  { %v191_v63 = vmul.f32 %v1016_v51, %v1306_v1  ;;  %v451_v4 = vsel %vm323_vm7, %v259_v47, %v387_v57  ;;  %v388_v6 = vmul.f32 0.1, %v260_v58  ;;  %v389_v8 = vmul.f32 0.1, %v261_v59 }
  0x68   :  { %v1156_v5 = vpack.c.bf16 %v451_v4, %v450_v61  ;;  %v192_v9 = vmul.f32 %v1017_v62, %v1306_v1 }
  0x69   :  { %v262_v10 = vadd.f32 %v1320_v7, %v191_v63  ;;  %v452_v14 = vsel %vm324_vm8, %v260_v58, %v388_v6  ;;  %v453_v15 = vsel %vm325_vm9, %v261_v59, %v389_v8 }
  0x6a   :  { %v263_v16 = vadd.f32 %v1320_v7, %v192_v9  ;;  %v1161_v19 = vpack.c.bf16 %v453_v15, %v452_v14 }
  0x6b   :  { %vm326_vm10 = vcmp.gt.f32.partialorder %v262_v10, 0.0  ;;  %v390_v20 = vmul.f32 0.1, %v262_v10 }
  0x6c   :  { %v1239_v0 = vld [vmem:[%s1631_s0 + $0xb0] sm:$0xff]   ;;  %v1240_v2 = vld [vmem:[%s1631_s0 + $0xb8] sm:$0xff]   ;;  %vm327_vm11 = vcmp.gt.f32.partialorder %v263_v16, 0.0  ;;  %v391_v22 = vmul.f32 0.1, %v263_v16 }
  0x6d   :  { %1266 = vst [vmem:[%s1634_s3 + $0x90] sm:$0xff] %v1151_v3   ;;  %v1020_v11 = vunpack.c.l.bf16 %v1239_v0  ;;  %v1021_v12 = vunpack.c.h.bf16 %v1239_v0  ;;  %v1024_v13 = vunpack.c.l.bf16 %v1240_v2  ;;  %1267 = vst [vmem:[%s1634_s3 + $0x98] sm:$0xff] %v1156_v5   ;;  %v1025_v17 = vunpack.c.h.bf16 %v1240_v2 }
  0x6e   :  { %v454_v25 = vsel %vm326_vm10, %v262_v10, %v390_v20  ;;  %v455_v29 = vsel %vm327_vm11, %v263_v16, %v391_v22 }
  0x6f   :  { %v193_v21 = vmul.f32 %v1020_v11, %v1306_v1  ;;  %v194_v23 = vmul.f32 %v1021_v12, %v1306_v1  ;;  %v195_v24 = vmul.f32 %v1024_v13, %v1306_v1  ;;  %v196_v27 = vmul.f32 %v1025_v17, %v1306_v1 }
  0x70   :  { %v1166_v33 = vpack.c.bf16 %v455_v29, %v454_v25 }
  0x71   :  { %v264_v26 = vadd.f32 %v1320_v7, %v193_v21  ;;  %v265_v30 = vadd.f32 %v1320_v7, %v194_v23  ;;  %v266_v31 = vadd.f32 %v1320_v7, %v195_v24  ;;  %v267_v35 = vadd.f32 %v1320_v7, %v196_v27 }
  0x73   :  { %vm328_vm12 = vcmp.gt.f32.partialorder %v264_v26, 0.0  ;;  %v392_v34 = vmul.f32 0.1, %v264_v26  ;;  %vm329_vm13 = vcmp.gt.f32.partialorder %v265_v30, 0.0  ;;  %v393_v37 = vmul.f32 0.1, %v265_v30 }
  0x74   :  { %v1241_v18 = vld [vmem:[%s1631_s0 + $0xc0] sm:$0xff]   ;;  %vm330_vm14 = vcmp.gt.f32.partialorder %v266_v31, 0.0  ;;  %v394_v38 = vmul.f32 0.1, %v266_v31  ;;  %vm331_vm15 = vcmp.gt.f32.partialorder %v267_v35, 0.0 }
  0x75   :  { %1268 = vst [vmem:[%s1634_s3 + $0xa0] sm:$0xff] %v1161_v19   ;;  %v1028_v28 = vunpack.c.l.bf16 %v1241_v18  ;;  %v1029_v32 = vunpack.c.h.bf16 %v1241_v18  ;;  %v456_v39 = vsel %vm328_vm12, %v264_v26, %v392_v34  ;;  %v395_v40 = vmul.f32 0.1, %v267_v35 }
  0x76   :  { %v457_v43 = vsel %vm329_vm13, %v265_v30, %v393_v37  ;;  %v458_v44 = vsel %vm330_vm14, %v266_v31, %v394_v38 }
  0x77   :  { %v197_v41 = vmul.f32 %v1028_v28, %v1306_v1  ;;  %v198_v45 = vmul.f32 %v1029_v32, %v1306_v1  ;;  %v1171_v47 = vpack.c.bf16 %v457_v43, %v456_v39  ;;  %v459_v48 = vsel %vm331_vm15, %v267_v35, %v395_v40 }
  0x78   :  { %v1176_v51 = vpack.c.bf16 %v459_v48, %v458_v44 }
  0x79   :  { %v268_v49 = vadd.f32 %v1320_v7, %v197_v41  ;;  %v269_v52 = vadd.f32 %v1320_v7, %v198_v45 }
  0x7b   :  { %vm332_vm0 = vcmp.gt.f32.partialorder %v268_v49, 0.0  ;;  %v396_v56 = vmul.f32 0.1, %v268_v49  ;;  %vm333_vm1 = vcmp.gt.f32.partialorder %v269_v52, 0.0  ;;  %v397_v59 = vmul.f32 0.1, %v269_v52 }
  0x7c   :  { %v1242_v36 = vld [vmem:[%s1631_s0 + $0xc8] sm:$0xff]  }
  0x7d   :  { %1269 = vst [vmem:[%s1634_s3 + $0xa8] sm:$0xff] %v1166_v33   ;;  %v1032_v46 = vunpack.c.l.bf16 %v1242_v36  ;;  %v1033_v50 = vunpack.c.h.bf16 %v1242_v36  ;;  %v460_v62 = vsel %vm332_vm0, %v268_v49, %v396_v56  ;;  %v461_v3 = vsel %vm333_vm1, %v269_v52, %v397_v59 }
  0x7e   :  { %v1181_v6 = vpack.c.bf16 %v461_v3, %v460_v62 }
  0x7f   :  { %v199_v53 = vmul.f32 %v1032_v46, %v1306_v1  ;;  %v200_v57 = vmul.f32 %v1033_v50, %v1306_v1 }
  0x81   :  { %v270_v60 = vadd.f32 %v1320_v7, %v199_v53  ;;  %v271_v63 = vadd.f32 %v1320_v7, %v200_v57 }
  0x83   :  { %vm334_vm2 = vcmp.gt.f32.partialorder %v270_v60, 0.0  ;;  %v398_v4 = vmul.f32 0.1, %v270_v60  ;;  %vm335_vm3 = vcmp.gt.f32.partialorder %v271_v63, 0.0  ;;  %v399_v8 = vmul.f32 0.1, %v271_v63 }
  0x84   :  { %v1243_v42 = vld [vmem:[%s1631_s0 + $0xd0] sm:$0xff]   ;;  %v1244_v55 = vld [vmem:[%s1631_s0 + $0xd8] sm:$0xff]  }
  0x85   :  { %v1036_v54 = vunpack.c.l.bf16 %v1243_v42  ;;  %1270 = vst [vmem:[%s1634_s3 + $0xb0] sm:$0xff] %v1171_v47   ;;  %v1037_v58 = vunpack.c.h.bf16 %v1243_v42  ;;  %1271 = vst [vmem:[%s1634_s3 + $0xb8] sm:$0xff] %v1176_v51   ;;  %v1040_v2 = vunpack.c.l.bf16 %v1244_v55  ;;  %v462_v11 = vsel %vm334_vm2, %v270_v60, %v398_v4 }
  0x86   :  { %v1041_v13 = vunpack.c.h.bf16 %v1244_v55  ;;  %v463_v15 = vsel %vm335_vm3, %v271_v63, %v399_v8 }
  0x87   :  { %v201_v61 = vmul.f32 %v1036_v54, %v1306_v1  ;;  %v202_v0 = vmul.f32 %v1037_v58, %v1306_v1  ;;  %v203_v17 = vmul.f32 %v1040_v2, %v1306_v1  ;;  %v1186_v18 = vpack.c.bf16 %v463_v15, %v462_v11 }
  0x88   :  { %v204_v20 = vmul.f32 %v1041_v13, %v1306_v1 }
  0x89   :  { %v272_v5 = vadd.f32 %v1320_v7, %v201_v61  ;;  %v273_v9 = vadd.f32 %v1320_v7, %v202_v0  ;;  %v274_v23 = vadd.f32 %v1320_v7, %v203_v17 }
  0x8a   :  { %v275_v27 = vadd.f32 %v1320_v7, %v204_v20 }
  0x8b   :  { %vm336_vm4 = vcmp.gt.f32.partialorder %v272_v5, 0.0  ;;  %v400_v12 = vmul.f32 0.1, %v272_v5  ;;  %vm337_vm5 = vcmp.gt.f32.partialorder %v273_v9, 0.0  ;;  %v401_v16 = vmul.f32 0.1, %v273_v9 }
  0x8c   :  { %v1245_v10 = vld [vmem:[%s1631_s0 + $0xe0] sm:$0xff]   ;;  %v1246_v14 = vld [vmem:[%s1631_s0 + $0xe8] sm:$0xff]   ;;  %vm338_vm6 = vcmp.gt.f32.partialorder %v274_v23, 0.0  ;;  %v402_v31 = vmul.f32 0.1, %v274_v23  ;;  %vm339_vm7 = vcmp.gt.f32.partialorder %v275_v27, 0.0 }
  0x8d   :  { %1272 = vst [vmem:[%s1634_s3 + $0xc0] sm:$0xff] %v1181_v6   ;;  %v464_v19 = vsel %vm336_vm4, %v272_v5, %v400_v12  ;;  %v1044_v21 = vunpack.c.l.bf16 %v1245_v10  ;;  %v465_v22 = vsel %vm337_vm5, %v273_v9, %v401_v16  ;;  %v1045_v24 = vunpack.c.h.bf16 %v1245_v10  ;;  %1273 = vst [vmem:[%s1634_s3 + $0xc8] sm:$0xff] %v1186_v18  }
  0x8e   :  { %v1048_v25 = vunpack.c.l.bf16 %v1246_v14  ;;  %v1191_v26 = vpack.c.bf16 %v465_v22, %v464_v19  ;;  %v1049_v29 = vunpack.c.h.bf16 %v1246_v14  ;;  %v403_v34 = vmul.f32 0.1, %v275_v27 }
  0x8f   :  { %v205_v28 = vmul.f32 %v1044_v21, %v1306_v1  ;;  %v206_v32 = vmul.f32 %v1045_v24, %v1306_v1  ;;  %v466_v37 = vsel %vm338_vm6, %v274_v23, %v402_v31 }
  0x90   :  { %v207_v33 = vmul.f32 %v1048_v25, %v1306_v1  ;;  %v208_v36 = vmul.f32 %v1049_v29, %v1306_v1  ;;  %v467_v41 = vsel %vm339_vm7, %v275_v27, %v403_v34 }
  0x91   :  { %v276_v35 = vadd.f32 %v1320_v7, %v205_v28  ;;  %v277_v38 = vadd.f32 %v1320_v7, %v206_v32  ;;  %v1196_v45 = vpack.c.bf16 %v467_v41, %v466_v37 }
  0x92   :  { %v278_v39 = vadd.f32 %v1320_v7, %v207_v33  ;;  %v279_v43 = vadd.f32 %v1320_v7, %v208_v36 }
  0x93   :  { %vm340_vm8 = vcmp.gt.f32.partialorder %v276_v35, 0.0  ;;  %v404_v42 = vmul.f32 0.1, %v276_v35  ;;  %vm341_vm9 = vcmp.gt.f32.partialorder %v277_v38, 0.0  ;;  %v405_v46 = vmul.f32 0.1, %v277_v38 }
  0x94   :  { %v1247_v30 = vld [vmem:[%s1631_s0 + $0xf0] sm:$0xff]   ;;  %vm342_vm10 = vcmp.gt.f32.partialorder %v278_v39, 0.0  ;;  %vm343_vm11 = vcmp.gt.f32.partialorder %v279_v43, 0.0  ;;  %v406_v48 = vmul.f32 0.1, %v278_v39 }
  0x95   :  { %1274 = vst [vmem:[%s1634_s3 + $0xd0] sm:$0xff] %v1191_v26   ;;  %v1052_v40 = vunpack.c.l.bf16 %v1247_v30  ;;  %v468_v47 = vsel %vm340_vm8, %v276_v35, %v404_v42  ;;  %v407_v49 = vmul.f32 0.1, %v279_v43  ;;  %v469_v50 = vsel %vm341_vm9, %v277_v38, %v405_v46 }
  0x96   :  { %v1053_v51 = vunpack.c.h.bf16 %v1247_v30  ;;  %v1201_v54 = vpack.c.bf16 %v469_v50, %v468_v47  ;;  %v470_v55 = vsel %vm342_vm10, %v278_v39, %v406_v48 }
  0x97   :  { %v209_v52 = vmul.f32 %v1052_v40, %v1306_v1  ;;  %v471_v56 = vsel %vm343_vm11, %v279_v43, %v407_v49 }
  0x98   :  { %v1206_v58 = vpack.c.bf16 %v471_v56, %v470_v55  ;;  %v210_v59 = vmul.f32 %v1053_v51, %v1306_v1 }
  0x99   :  { %v280_v60 = vadd.f32 %v1320_v7, %v209_v52 }
  0x9a   :  { %v281_v63 = vadd.f32 %v1320_v7, %v210_v59 }
  0x9b   :  { %vm344_vm12 = vcmp.gt.f32.partialorder %v280_v60, 0.0  ;;  %v408_v0 = vmul.f32 0.1, %v280_v60 }
  0x9c   :  { %v1248_v44 = vld [vmem:[%s1631_s0 + $0xf8] sm:$0xff]   ;;  %vm345_vm13 = vcmp.gt.f32.partialorder %v281_v63, 0.0  ;;  %v409_v4 = vmul.f32 0.1, %v281_v63 }
  0x9d   :  { %1275 = vst [vmem:[%s1634_s3 + $0xd8] sm:$0xff] %v1196_v45   ;;  %v1056_v53 = vunpack.c.l.bf16 %v1248_v44  ;;  %v1057_v57 = vunpack.c.h.bf16 %v1248_v44  ;;  %1276 = vst [vmem:[%s1634_s3 + $0xe0] sm:$0xff] %v1201_v54   ;;  %v472_v5 = vsel %vm344_vm12, %v280_v60, %v408_v0 }
  0x9e   :  { %1277 = vst [vmem:[%s1634_s3 + $0xe8] sm:$0xff] %v1206_v58  }
  0x9f   :  { %v211_v61 = vmul.f32 %v1056_v53, %v1306_v1  ;;  %v212_v62 = vmul.f32 %v1057_v57, %v1306_v1  ;;  %v473_v1 = vsel %vm345_vm13, %v281_v63, %v409_v4 }
  0xa0   :  { %v1211_v9 = vpack.c.bf16 %v473_v1, %v472_v5 }
  0xa1   :  { %v282_v2 = vadd.f32 %v1320_v7, %v211_v61  ;;  %v283_v3 = vadd.f32 %v1320_v7, %v212_v62 }
  0xa2   :  { %1278 = vst [vmem:[%s1634_s3 + $0xf0] sm:$0xff] %v1211_v9  }
  0xa3   :  { %vm346_vm14 = vcmp.gt.f32.partialorder %v282_v2, 0.0  ;;  %vm347_vm15 = vcmp.gt.f32.partialorder %v283_v3, 0.0  ;;  %v410_v6 = vmul.f32 0.1, %v282_v2  ;;  %v411_v8 = vmul.f32 0.1, %v283_v3 }
  0xa5   :  { %v474_v10 = vsel %vm346_vm14, %v282_v2, %v410_v6  ;;  %v475_v11 = vsel %vm347_vm15, %v283_v3, %v411_v8 }
  0xa6   :  { %v1216_v12 = vpack.c.bf16 %v475_v11, %v474_v10 }
  0xa8   :  { %1279 = vst [vmem:[%s1634_s3 + $0xf8] sm:$0xff] %v1216_v12  }

// kernel: cnn_block_forward.2
= control target key start
LH: loop header
LB: loop body
LE: loop exit
PB: predicated region body
PF: predicated region fallthrough
CT: control target
= control target key end

     0   :  { %s2693_s15 = smov 0   ;;  %s3274_s0 = inlined_call_operand.vmem [shape: bf16[4,10,18,4], index: 0, kind: input, shape index: {}]   ;;  %s3275_s1 = inlined_call_operand.vmem [shape: bf16[3,3,4,128], index: 1, kind: input, shape index: {}]   ;;  %s3276_s2 = inlined_call_operand.vmem [shape: bf16[4,128,128], index: 2, kind: output, shape index: {0}]   ;;  %s3277_s3 = inlined_call_operand.vmem [shape: f32[4,1,128], index: 3, kind: output, shape index: {1}]   ;;  %s3278_s4 = inlined_call_operand.vmem [shape: f32[4,1,128], index: 4, kind: output, shape index: {2}]  }
   0x1 LB: > { %s2048_s16 = sadd.s32 4294967295, %s2666_s15   ;;  %p2052_p0 = scmp.ge.s32.totalorder %s2666_s15, 1  ;;  %s2666_s15 = sphi %s2693_s15, %s15_s15  }
   0x2   : > { %p167_p1 = scmp.lt.s32.totalorder %s2666_s15, 5 }
   0x4   : > { %p168_p2 = pnand %p2052_p0, %p167_p1 }
   0x5   : > { %v2056_v0 = vld [vmem:[%s3275_s1 + $0x2] sm:$0x3] (!%p168_p2)  ;;  %vm493_vm0 = vcmask (!%p168_p2), 1041408   ;;  %v2707_v1 = vld [vmem:[%s3275_s1 + $0x8] sm:$0x3] (!%p168_p2)  ;;  %p199_p3 = scmp.lt.s32.totalorder (!%p168_p2), %s2048_s16, 3 }
   0x6   : > { %171 = sbr.rel (%p168_p2) target bundleno = 414 (0x19e), region = 28  ;;  %2631 = vmatprep.subr.msk.bf16.mxu1 (!%p168_p2), %vm493_vm0, %v2056_v0  ;;  %2635 = vmatprep.subr.msk.bf16.mxu0 (!%p168_p2), %vm493_vm0, %v2707_v1  ;;  %v495_v2 = vsel (!%p168_p2), %vm493_vm0, %v2056_v0, 0  ;;  %v2715_v3 = vsel (!%p168_p2), %vm493_vm0, %v2707_v1, 0  ;;  %v246_v4 = vld [vmem:[%s3275_s1] sm:$0x3] (!%p168_p2)  ;;  %vm468_vm3 = vcmask (!%p168_p2), 31744  }
   0x7   : > { %2340 = vmatpush3.bf16.msra.mxu1 (!%p168_p2), %v495_v2  ;;  %2412 = vmatpush3.bf16.msra.mxu0 (!%p168_p2), %v2715_v3  ;;  %v2135_v5 = vld [vmem:[%s3275_s1 + $0xa] sm:$0x3] (!%p168_p2)  ;;  %vm247_vm1 = vsmask.f32 (!%p168_p2), 3328  ;;  %vm248_vm2 = vsmask.f32 (!%p168_p2), 7440 }
   0x8   : > { %2632 = vmatprep.subr.msk.bf16.mxu1 (!%p168_p2), %vm493_vm0, %v246_v4  ;;  %2637 = vmatprep.subr.msk.bf16.mxu0 (!%p168_p2), %vm493_vm0, %v2135_v5  ;;  %v2735_v6 = vsel (!%p168_p2), %vm493_vm0, %v246_v4, 0  ;;  %v2761_v18 = vsel (!%p168_p2), %vm493_vm0, %v2135_v5, 0  ;;  %v2766_v23 = vld [vmem:[%s3275_s1 + $0xc] sm:$0x3] (!%p168_p2)  ;;  %vm2778_vm4 = vmor (!%p168_p2), %vm247_vm1, %vm248_vm2  ;;  %vm766_vm5 = vcmask (!%p168_p2), 1042432   ;;  %vm767_vm6 = vcmask (!%p168_p2), 1046532  }
   0x9   : > { %v2787_v38 = vsel (!%p168_p2), %vm493_vm0, %v2766_v23, 0  ;;  %vm2861_vm7 = vmor (!%p168_p2), %vm766_vm5, %vm767_vm6 }
   0xd   : > { %s3284_s16 = smov (!%p199_p3, %s2048_s16), 3 }
   0xe   : > { %s2641_s25 = smul.u32 120, %s3284_s16  ;;  %s2194_s13 = sshll.u32 %s3284_s16, 6 }
   0xf   : > { %s3253_s18 = scalar_lea.vmem %s3276_s2, %s2194_s13  ;;  %s211_s21 = scalar_lea.vmem %s3277_s3, %s3284_s16 }
  0x10   : > { %s2732_s28 = scalar_lea.vmem %s3274_s0, %s2641_s25  ;;  %s214_s24 = scalar_lea.vmem %s3278_s4, %s3284_s16 }
  0x11   : > { %v2738_v7 = vld [vmem:[%s2732_s28] sm:$0xf]  ;;  %v2741_v8 = vld [vmem:[%s2732_s28 + $0x4] sm:$0xf]  ;;  %v2744_v9 = vld [vmem:[%s2732_s28 + $0x8] sm:$0x1] }
  0x12   : > { %v251_v10 = vshrl.u32 %v2738_v7, 16  ;;  %v254_v11 = vshll.u32 %v2738_v7, 16  ;;  %v260_v12 = vshll.u32 %v2741_v8, 16  ;;  %v264_v13 = vshrl.u32 %v2741_v8, 16  ;;  %v2751_v14 = vld [vmem:[%s2732_s28 + $0xc] sm:$0xf] }
  0x13   : > { %v270_v15 = vshll.u32 %v2744_v9, 16  ;;  %v2755_v16 = vld [vmem:[%s2732_s28 + $0x10] sm:$0xf]  ;;  %v2758_v17 = vld [vmem:[%s2732_s28 + $0x14] sm:$0x1]  ;;  %v275_v25 = vshrl.u32 %v2751_v14, 16 }
  0x14   : > { %v253_v19 = vrot.slane %v251_v10, 4  ;;  %v256_v20 = vrot.slane %v254_v11, 5  ;;  %v262_v21 = vrot.slane %v260_v12, 5  ;;  %v266_v22 = vrot.slane %v264_v13, 4  ;;  %v2774_v32 = vld [vmem:[%s2732_s28 + $0x18] sm:$0xf] }
  0x15   : > { %v272_v24 = vrot.slane %v270_v15, 5  ;;  %v278_v26 = vshll.u32 %v2751_v14, 16  ;;  %v284_v27 = vshll.u32 %v2755_v16, 16  ;;  %v288_v30 = vshrl.u32 %v2755_v16, 16  ;;  %v2783_v37 = vld [vmem:[%s2732_s28 + $0x1c] sm:$0xf] }
  0x16   : > { %v257_v28 = vor.u32 %v256_v20, %v253_v19  ;;  %v267_v29 = vor.u32 %v266_v22, %v262_v21  ;;  %v294_v31 = vshll.u32 %v2758_v17, 16  ;;  %v277_v34 = vrot.slane %v275_v25, 4  ;;  %v2791_v45 = vld [vmem:[%s2732_s28 + $0x20] sm:$0x1]  ;;  %v2801_v56 = vld [vmem:[%s2732_s28 + $0x24] sm:$0xf] }
  0x17   : > { %v280_v35 = vrot.slane %v278_v26, 5  ;;  %v286_v36 = vrot.slane %v284_v27, 5  ;;  %v290_v41 = vrot.slane %v288_v30, 4  ;;  %v781_v44 = vrot.slane %v2758_v17, 5  ;;  %v2806_v61 = vld [vmem:[%s2732_s28 + $0x28] sm:$0xf] }
  0x18   : > { %v258_v39 = vrot.slane %v257_v28, 4  ;;  %v268_v40 = vrot.slane %v267_v29, 4  ;;  %v296_v42 = vrot.slane %v294_v31, 5  ;;  %v299_v46 = vshrl.u32 %v2774_v32, 16  ;;  %v2814_v4 = vld [vmem:[%s2732_s28 + $0x2c] sm:$0x1] }
  0x19   : > { %v281_v43 = vor.u32 %v280_v35, %v277_v34  ;;  %v302_v47 = vshll.u32 %v2774_v32, 16  ;;  %v291_v50 = vor.u32 %v290_v41, %v286_v36  ;;  %v308_v51 = vshll.u32 %v2783_v37, 16  ;;  %v2820_v13 = vld [vmem:[%s2732_s28 + $0x30] sm:$0xf]  ;;  %v2827_v22 = vld [vmem:[%s3275_s1 + $0x4] sm:$0x3] }
  0x1a   : > { %v263_v48 = vsel %vm2778_vm4, %v258_v39, %v262_v21  ;;  %v273_v49 = vsel %vm2778_vm4, %v268_v40, %v272_v24  ;;  %v301_v54 = vrot.slane %v299_v46, 4  ;;  %v312_v59 = vshrl.u32 %v2783_v37, 16  ;;  %v2832_v28 = vld [vmem:[%s2732_s28 + $0x34] sm:$0xf]  ;;  %v2839_v34 = vld [vmem:[%s2732_s28 + $0x38] sm:$0x1] }
  0x1b   : > { %v2057_v52 = vcombine.low %v263_v48, %v273_v49  ;;  %v282_v53 = vrot.slane %v281_v43, 4  ;;  %v304_v55 = vrot.slane %v302_v47, 5  ;;  %v292_v57 = vrot.slane %v291_v50, 4 }
  0x1c   : > { %v310_v58 = vrot.slane %v308_v51, 5  ;;  %v318_v60 = vshll.u32 %v2791_v45, 16  ;;  %v785_v0 = vrot.slane %v2783_v37, 5  ;;  %v788_v2 = vrot.slane %v2791_v45, 5  ;;  %v2852_v51 = vld [vmem:[%s2732_s28 + $0x3c] sm:$0xf] }
  0x1d   : > { %2341 = vmatprep.mubr.msk.bf16.mxu1 %vm468_vm3, %v2057_v52  ;;  %v287_v62 = vsel %vm2778_vm4, %v282_v53, %v286_v36  ;;  %v305_v63 = vor.u32 %v304_v55, %v301_v54  ;;  %v297_v5 = vsel %vm2778_vm4, %v292_v57, %v296_v42  ;;  %v314_v10 = vrot.slane %v312_v59, 4  ;;  %v2857_v57 = vld [vmem:[%s2732_s28 + $0x40] sm:$0xf] }
  0x1e   : > { %v320_v11 = vrot.slane %v318_v60, 5  ;;  %v323_v12 = vshrl.u32 %v2801_v56, 16  ;;  %v2058_v15 = vcombine.low %v287_v62, %v297_v5  ;;  %v326_v20 = vshll.u32 %v2801_v56, 16 }
  0x1f   : > { %v306_v19 = vrot.slane %v305_v63, 4  ;;  %v332_v21 = vshll.u32 %v2806_v61, 16  ;;  %v315_v24 = vor.u32 %v314_v10, %v310_v58  ;;  %v336_v26 = vshrl.u32 %v2806_v61, 16 }
  0x20   : > { %v325_v25 = vrot.slane %v323_v12, 4  ;;  %v342_v27 = vshll.u32 %v2814_v4, 16  ;;  %2413 = vmatprep.mubr.msk.bf16.mxu0 %vm468_vm3, %v2058_v15  ;;  %2342 = vmatmul.mubr.msk.bf16.vlgmr.msra.gmra.mrb[0].mxu1 %vm468_vm3, %v2058_v15  ;;  %v328_v30 = vrot.slane %v326_v20, 5  ;;  %v347_v35 = vshrl.u32 %v2820_v13, 16  ;;  %v2878_v20 = vld [vmem:[%s2732_s28 + $0x44] sm:$0x1] }
  0x21   : > { %v311_v29 = vsel %vm2778_vm4, %v306_v19, %v310_v58  ;;  %v334_v31 = vrot.slane %v332_v21, 5  ;;  %2358 = vmatpush3.bf16.msra.mxu1 %v2735_v6  ;;  %v316_v36 = vrot.slane %v315_v24, 4  ;;  %v338_v39 = vrot.slane %v336_v26, 4 }
  0x22   : > { %v344_v40 = vrot.slane %v342_v27, 5  ;;  %v350_v41 = vshll.u32 %v2820_v13, 16  ;;  %v329_v42 = vor.u32 %v328_v30, %v325_v25  ;;  %v349_v43 = vrot.slane %v347_v35, 4  ;;  %2633 = vmatprep.subr.msk.bf16.mxu1 %vm493_vm0, %v2827_v22 }
  0x23   : > { %v356_v46 = vshll.u32 %v2832_v28, 16  ;;  %v360_v47 = vshrl.u32 %v2832_v28, 16  ;;  %v321_v48 = vsel %vm2778_vm4, %v316_v36, %v320_v11  ;;  %v339_v49 = vor.u32 %v338_v39, %v334_v31  ;;  %v2891_v36 = vld [vmem:[%s2732_s28 + $0x48] sm:$0xf] }
  0x24   : > { %v352_v6 = vrot.slane %v350_v41, 5  ;;  %v366_v50 = vshll.u32 %v2839_v34, 16  ;;  %v2854_v52 = vcombine.low %v311_v29, %v321_v48  ;;  %v330_v53 = vrot.slane %v329_v42, 4  ;;  %v2906_v42 = vld [vmem:[%s2732_s28 + $0x4c] sm:$0xf] }
  0x25   : > { %v358_v54 = vrot.slane %v356_v46, 5  ;;  %v362_v55 = vrot.slane %v360_v47, 4  ;;  %v340_v58 = vrot.slane %v339_v49, 4  ;;  %v2090_v63 = vrot.slane %v2751_v14, 9 }
  0x26   : > { %v353_v59 = vor.u32 %v352_v6, %v349_v43  ;;  %v368_v60 = vrot.slane %v366_v50, 5  ;;  %2414 = vmatmul.mubr.msk.bf16.vlgmr.msra.gmra.mrb[0].mxu0 %vm468_vm3, %v2854_v52  ;;  %2345 = vmatprep.mubr.msk.bf16.mxu1 %vm468_vm3, %v2854_v52  ;;  %v335_v5 = vsel %vm2778_vm4, %v330_v53, %v334_v31  ;;  %v778_v11 = vrot.slane %v2755_v16, 5 }
  0x27   : > { %v363_v10 = vor.u32 %v362_v55, %v358_v54  ;;  %v371_v12 = vshrl.u32 %v2852_v51, 16  ;;  %2430 = vmatpush3.bf16.msra.mxu0 %v2761_v18  ;;  %v345_v15 = vsel %vm2778_vm4, %v340_v58, %v344_v40  ;;  %v374_v21 = vshll.u32 %v2852_v51, 16 }
  0x28   : > { %v354_v19 = vrot.slane %v353_v59, 4  ;;  %v380_v24 = vshll.u32 %v2857_v57, 16  ;;  %v2882_v25 = vcombine.low %v335_v5, %v345_v15  ;;  %v779_v27 = vsel %vm2861_vm7, %v2090_v63, %v778_v11  ;;  %2638 = vmatprep.subr.msk.bf16.mxu0 %vm493_vm0, %v2766_v23 }
  0x29   : > { %v364_v26 = vrot.slane %v363_v10, 4  ;;  %v780_v29 = vrot.slane %v778_v11, 4  ;;  %v373_v30 = vrot.slane %v371_v12, 4  ;;  %v376_v31 = vrot.slane %v374_v21, 5 }
  0x2a   : > { %v359_v18 = vsel %vm2778_vm4, %v354_v19, %v358_v54  ;;  %v382_v35 = vrot.slane %v380_v24, 5  ;;  %2417 = vmatprep.mubr.msk.bf16.mxu0 %vm468_vm3, %v2882_v25  ;;  %2346 = vmatmul.mubr.msk.bf16.gmra.mrb[4].mxu1 %vm468_vm3, %v2882_v25  ;;  %v384_v40 = vshrl.u32 %v2857_v57, 16  ;;  %v390_v41 = vshll.u32 %v2878_v20, 16  ;;  %v2923_v54 = vld [vmem:[%s2732_s28 + $0x50] sm:$0x1] }
  0x2b   : > { %v369_v39 = vsel %vm2778_vm4, %v364_v26, %v368_v60  ;;  %v782_v23 = vsel %vm2861_vm7, %v780_v29, %v781_v44  ;;  %v377_v47 = vor.u32 %v376_v31, %v373_v30  ;;  %v2091_v48 = vrot.slane %v2774_v32, 9  ;;  %v2948_v29 = vld [vmem:[%s2732_s28 + $0x58] sm:$0xf] }
  0x2c   : > { %v2908_v43 = vcombine.low %v359_v18, %v369_v39  ;;  %v2910_v46 = vcombine.low %v779_v27, %v782_v23  ;;  %v386_v49 = vrot.slane %v384_v40, 4  ;;  %v392_v17 = vrot.slane %v390_v41, 5  ;;  %v2954_v39 = vld [vmem:[%s2732_s28 + $0x5c] sm:$0x1] }
  0x2d   : > { %v787_v6 = vrot.slane %v785_v0, 4  ;;  %v395_v44 = vshrl.u32 %v2891_v36, 16  ;;  %v378_v50 = vrot.slane %v377_v47, 4  ;;  %v786_v53 = vsel %vm2861_vm7, %v2091_v48, %v785_v0  ;;  %v2935_v0 = vld [vmem:[%s2732_s28 + $0x54] sm:$0xf] }
  0x2e   : > { %2349 = vmatprep.mubr.msk.bf16.mxu1 %vm468_vm3, %v2908_v43  ;;  %v398_v55 = vshll.u32 %v2891_v36, 16  ;;  %v404_v58 = vshll.u32 %v2906_v42, 16  ;;  %2418 = vmatmul.mubr.msk.bf16.gmra.mrb[4].mxu0 %vm468_vm3, %v2908_v43  ;;  %v387_v59 = vor.u32 %v386_v49, %v382_v35  ;;  %v408_v5 = vshrl.u32 %v2906_v42, 16 }
  0x2f   : > { %v789_v60 = vsel %vm2861_vm7, %v787_v6, %v788_v2  ;;  %v397_v63 = vrot.slane %v395_v44, 4  ;;  %2431 = vmatprep.mubr.msk.bf16.mxu0 %vm468_vm3, %v2910_v46  ;;  %v383_v10 = vsel %vm2778_vm4, %v378_v50, %v382_v35  ;;  %v414_v2 = vshll.u32 %v2923_v54, 16 }
  0x30   : > { %v2941_v11 = vcombine.low %v786_v53, %v789_v60  ;;  %v400_v12 = vrot.slane %v398_v55, 5  ;;  %v406_v45 = vrot.slane %v404_v58, 5  ;;  %v388_v15 = vrot.slane %v387_v59, 4  ;;  %v2973_v58 = vld [vmem:[%s3275_s1 + $0xe] sm:$0x3] }
  0x31   : > { %v410_v19 = vrot.slane %v408_v5, 4  ;;  %v2092_v21 = vrot.slane %v2801_v56, 9  ;;  %v792_v26 = vrot.slane %v2806_v61, 5  ;;  %v795_v27 = vrot.slane %v2814_v4, 5 }
  0x32   : > { %v401_v24 = vor.u32 %v400_v12, %v397_v63  ;;  %v419_v18 = vshrl.u32 %v2935_v0, 16  ;;  %v393_v30 = vsel %vm2778_vm4, %v388_v15, %v392_v17  ;;  %v416_v35 = vrot.slane %v414_v2, 5 }
  0x33   : > { %v411_v31 = vor.u32 %v410_v19, %v406_v45  ;;  %v422_v23 = vshll.u32 %v2935_v0, 16  ;;  %v2957_v40 = vcombine.low %v383_v10, %v393_v30  ;;  %v793_v47 = vsel %vm2861_vm7, %v2092_v21, %v792_v26 }
  0x34   : > { %v402_v41 = vrot.slane %v401_v24, 4  ;;  %v794_v4 = vrot.slane %v792_v26, 4  ;;  %v421_v49 = vrot.slane %v419_v18, 4  ;;  %v428_v44 = vshll.u32 %v2948_v29, 16 }
  0x35   : > { %v412_v48 = vrot.slane %v411_v31, 4  ;;  %v424_v6 = vrot.slane %v422_v23, 5  ;;  %2350 = vmatmul.mubr.msk.bf16.gmra.mrb[8].mxu1 %vm468_vm3, %v2957_v40  ;;  %v432_v53 = vshrl.u32 %v2948_v29, 16  ;;  %v438_v55 = vshll.u32 %v2954_v39, 16 }
  0x36   : > { %v407_v17 = vsel %vm2778_vm4, %v402_v41, %v406_v45  ;;  %v796_v50 = vsel %vm2861_vm7, %v794_v4, %v795_v27  ;;  %2432 = vmatmul.mubr.msk.bf16.vlgmr.msra.gmra.mrb[0].mxu0 %vm468_vm3, %v2941_v11  ;;  %v430_v5 = vrot.slane %v428_v44, 5  ;;  %v2093_v45 = vrot.slane %v2820_v13, 9 }
  0x37   : > { %v417_v59 = vsel %vm2778_vm4, %v412_v48, %v416_v35  ;;  %v2979_v60 = vcombine.low %v793_v47, %v796_v50  ;;  %v425_v63 = vor.u32 %v424_v6, %v421_v49  ;;  %2448 = vmatpush3.bf16.msra.mxu0 %v2787_v38  ;;  %v434_v12 = vrot.slane %v432_v53, 4  ;;  %v3017_v53 = vld [vmem:[%s2732_s28 + $0x64] sm:$0xf] }
  0x38   : > { %v2982_v10 = vcombine.low %v407_v17, %v417_v59  ;;  %v799_v19 = vrot.slane %v2832_v28, 5  ;;  %v802_v2 = vrot.slane %v2839_v34, 5  ;;  %v2094_v21 = vrot.slane %v2852_v51, 9  ;;  %2639 = vmatprep.subr.msk.bf16.mxu0 %vm493_vm0, %v2973_v58 }
  0x39   : > { %2435 = vmatprep.mubr.msk.bf16.mxu0 %vm468_vm3, %v2979_v60  ;;  %v426_v15 = vrot.slane %v425_v63, 4  ;;  %v435_v38 = vor.u32 %v434_v12, %v430_v5  ;;  %v440_v24 = vrot.slane %v438_v55, 5  ;;  %v806_v26 = vrot.slane %v2857_v57, 5 }
  0x3a   : > { %2353 = vmatprep.mubr.msk.bf16.mxu1 %vm468_vm3, %v2982_v10  ;;  %v809_v27 = vrot.slane %v2878_v20, 5  ;;  %v800_v18 = vsel %vm2861_vm7, %v2093_v45, %v799_v19  ;;  %v801_v30 = vrot.slane %v799_v19, 4  ;;  %v2073_v34 = vcombine.low %v2738_v7, %v2741_v8  ;;  %v3039_v19 = vld [vmem:[%s2732_s28 + $0x68] sm:$0x1] }
  0x3b   : > { %v813_v31 = vrot.slane %v2906_v42, 5  ;;  %v431_v35 = vsel %vm2778_vm4, %v426_v15, %v430_v5  ;;  %v436_v23 = vrot.slane %v435_v38, 4  ;;  %v807_v41 = vsel %vm2861_vm7, %v2094_v21, %v806_v26  ;;  %v3028_v5 = vld [vmem:[%s2732_s28 + $0x60] sm:$0xf] }
  0x3c   : > { %v808_v47 = vrot.slane %v806_v26, 4  ;;  %v803_v20 = vsel %vm2861_vm7, %v801_v30, %v802_v2  ;;  %v2095_v4 = vrot.slane %v2891_v36, 9  ;;  %v816_v49 = vrot.slane %v2923_v54, 5 }
  0x3d   : > { %v815_v48 = vrot.slane %v813_v31, 4  ;;  %v441_v6 = vsel %vm2778_vm4, %v436_v23, %v440_v24  ;;  %v3011_v44 = vcombine.low %v800_v18, %v803_v20  ;;  %v2096_v50 = vrot.slane %v2935_v0, 9  ;;  %v3064_v23 = vld [vmem:[%s2732_s28 + $0x70] sm:$0xf] }
  0x3e   : > { %v810_v17 = vsel %vm2861_vm7, %v808_v47, %v809_v27  ;;  %v3019_v55 = vcombine.low %v431_v35, %v441_v6  ;;  %v820_v63 = vrot.slane %v2948_v29, 5  ;;  %v823_v54 = vrot.slane %v2954_v39, 5 }
  0x3f   : > { %v3021_v59 = vcombine.low %v807_v41, %v810_v17  ;;  %2436 = vmatmul.mubr.msk.bf16.gmra.mrb[4].mxu0 %vm468_vm3, %v3011_v44  ;;  %v814_v12 = vsel %vm2861_vm7, %v2095_v4, %v813_v31  ;;  %v817_v45 = vsel %vm2861_vm7, %v815_v48, %v816_v49  ;;  %v1268_v39 = vrot.slane %v3017_v53, 5  ;;  %v245_v49 = vld [vmem:[%s2732_s28 + $0x74] sm:$0x1] }
  0x40   : > { %2354 = vmatmul.mubr.msk.bf16.gmra.mrb[12].mxu1 %vm468_vm3, %v3019_v55  ;;  %v822_v15 = vrot.slane %v820_v63, 4  ;;  %v821_v2 = vsel %vm2861_vm7, %v2096_v50, %v820_v63  ;;  %v774_v21 = vrot.slane %v2744_v9, 5  ;;  %v2134_v24 = vrot.slane %v3028_v5, 9 }
  0x41   : > { %2439 = vmatprep.mubr.msk.bf16.mxu0 %vm468_vm3, %v3021_v59  ;;  %2359 = vmatprep.mubr.msk.bf16.mxu1 %vm468_vm3, %v2073_v34  ;;  %v2089_v26 = vrot.slane %v2738_v7, 9  ;;  %v3050_v27 = vcombine.low %v814_v12, %v817_v45  ;;  %v1270_v18 = vrot.slane %v1268_v39, 4  ;;  %v1271_v30 = vrot.slane %v3039_v19, 5  ;;  %v3055_v34 = vld [vmem:[%s2732_s28 + $0x6c] sm:$0xf] }
  0x42   : > { %v824_v38 = vsel %vm2861_vm7, %v822_v15, %v823_v54  ;;  %v771_v31 = vrot.slane %v2741_v8, 5  ;;  %v3059_v9 = vcombine.low %v2751_v14, %v2755_v16  ;;  %v1524_v7 = vshrl.u32 %v3055_v34, 16 }
  0x43   : > { %v3061_v35 = vcombine.low %v821_v2, %v824_v38  ;;  %v1527_v41 = vshll.u32 %v3055_v34, 16  ;;  %v3070_v47 = vcombine.low %v2774_v32, %v2783_v37  ;;  %v1537_v4 = vshrl.u32 %v3064_v23, 16  ;;  %v2114_v37 = vld [vmem:[%s3275_s1 + $0x6] sm:$0x3] }
  0x44   : > { %v772_v8 = vsel %vm2861_vm7, %v2089_v26, %v771_v31  ;;  %v773_v20 = vrot.slane %v771_v31, 4  ;;  %v876_v14 = vsel %vm493_vm0, %v2827_v22, 0  ;;  %v1269_v16 = vsel %vm2861_vm7, %v2134_v24, %v1268_v39 }
  0x45   : > { %v1272_v48 = vsel %vm2861_vm7, %v1270_v18, %v1271_v30  ;;  %v1526_v6 = vrot.slane %v1524_v7, 4  ;;  %v1529_v17 = vrot.slane %v1527_v41, 5  ;;  %v1533_v63 = vshll.u32 %v3064_v23, 16 }
  0x46   : > { %v775_v32 = vsel %vm2861_vm7, %v773_v20, %v774_v21  ;;  %v1539_v54 = vrot.slane %v1537_v4, 4  ;;  %v3096_v12 = vcombine.low %v1269_v16, %v1272_v48  ;;  %v1543_v45 = vshll.u32 %v245_v49, 16 }
  0x47   : > { %2440 = vmatmul.mubr.msk.bf16.gmra.mrb[8].mxu0 %vm468_vm3, %v3050_v27  ;;  %v2098_v22 = vcombine.low %v772_v8, %v775_v32  ;;  %v1530_v50 = vor.u32 %v1529_v17, %v1526_v6  ;;  %v2165_v15 = vrot.slane %v3055_v34, 9  ;;  %v1535_v2 = vrot.slane %v1533_v63, 5 }
  0x48   : > { %2360 = vmatmul.mubr.msk.bf16.vlgmr.msra.gmra.mrb[0].mxu1 %vm468_vm3, %v3059_v9  ;;  %2443 = vmatprep.mubr.msk.bf16.mxu0 %vm468_vm3, %v3061_v35  ;;  %v1674_v21 = vrot.slane %v3064_v23, 5  ;;  %v1677_v38 = vrot.slane %v245_v49, 5  ;;  %v3103_v24 = vcombine.low %v2801_v56, %v2806_v61  ;;  %v3107_v26 = vcombine.low %v2820_v13, %v2832_v28 }
  0x49   : > { %2376 = vmatpush3.bf16.msra.mxu1 %v876_v14  ;;  %2363 = vmatprep.mubr.msk.bf16.mxu1 %vm468_vm3, %v3070_v47  ;;  %v1531_v39 = vrot.slane %v1530_v50, 4  ;;  %v1545_v18 = vrot.slane %v1543_v45, 5  ;;  %v1540_v31 = vor.u32 %v1539_v54, %v1535_v2  ;;  %v3133_v62 = vcombine.low %v2852_v51, %v2857_v57  ;;  %v2166_v14 = vld [vmem:[%s3275_s1 + $0x10] sm:$0x3] }
  0x4a   : > { %2634 = vmatprep.subr.msk.bf16.mxu1 %vm493_vm0, %v2114_v37  ;;  %v3113_v7 = vsel %vm2861_vm7, %v2165_v15, %v1674_v21  ;;  %v1676_v41 = vrot.slane %v1674_v21, 4  ;;  %v1556_v20 = vsel %vm493_vm0, %v2973_v58, 0  ;;  %v3139_v4 = vcombine.low %v2891_v36, %v2906_v42 }
  0x4b   : > { %v1536_v30 = vsel %vm2778_vm4, %v1531_v39, %v1535_v2  ;;  %v1541_v8 = vrot.slane %v1540_v31, 4  ;;  %v2080_v51 = vcombine.low %v2935_v0, %v2948_v29  ;;  %v2115_v57 = vcombine.low %v3028_v5, %v3017_v53 }
  0x4c   : > { %v3119_v56 = vsel %vm2861_vm7, %v1676_v41, %v1677_v38  ;;  %v1002_v36 = vsel %vm493_vm0, %v2114_v37, 0  ;;  %v2146_v42 = vcombine.low %v3055_v34, %v3064_v23  ;;  %v1121_v0 = vshll.u32 %v3028_v5, 16 }
  0x4d   : > { %v2167_v61 = vcombine.low %v3113_v7, %v3119_v56  ;;  %v1546_v13 = vsel %vm2778_vm4, %v1541_v8, %v1545_v18  ;;  %v1131_v29 = vshrl.u32 %v3017_v53, 16  ;;  %v1688_v58 = vsel %vm493_vm0, %v2166_v14, 0 }
  0x4e   : > { %v2156_v28 = vcombine.low %v1536_v30, %v1546_v13  ;;  %v1123_v23 = vrot.slane %v1121_v0, 5 }
  0x4f   : > { %2444 = vmatmul.mubr.msk.bf16.gmra.mrb[12].mxu0 %vm468_vm3, %v3096_v12  ;;  %v1133_v48 = vrot.slane %v1131_v29, 4 }
  0x50   : > { %2364 = vmatmul.mubr.msk.bf16.gmra.mrb[4].mxu1 %vm468_vm3, %v3103_v24  ;;  %2449 = vmatprep.mubr.msk.bf16.mxu0 %vm468_vm3, %v3070_v47 }
  0x51   : > { %2367 = vmatprep.mubr.msk.bf16.mxu1 %vm468_vm3, %v3107_v26 }
  0x57   : > { %2450 = vmatmul.mubr.msk.bf16.vlgmr.msra.gmra.mrb[0].mxu0 %vm468_vm3, %v3103_v24 }
  0x58   : > { %2368 = vmatmul.mubr.msk.bf16.gmra.mrb[8].mxu1 %vm468_vm3, %v3133_v62  ;;  %2466 = vmatpush3.bf16.msra.mxu0 %v1556_v20 }
  0x59   : > { %2371 = vmatprep.mubr.msk.bf16.mxu1 %vm468_vm3, %v3139_v4  ;;  %2453 = vmatprep.mubr.msk.bf16.mxu0 %vm468_vm3, %v3107_v26 }
  0x5a   : > { %2640 = vmatprep.subr.msk.bf16.mxu0 %vm493_vm0, %v2166_v14 }
  0x5f   : > { %2454 = vmatmul.mubr.msk.bf16.gmra.mrb[4].mxu0 %vm468_vm3, %v3133_v62 }
  0x60   : > { %2372 = vmatmul.mubr.msk.bf16.gmra.mrb[12].mxu1 %vm468_vm3, %v2080_v51  ;;  %2457 = vmatprep.mubr.msk.bf16.mxu0 %vm468_vm3, %v3139_v4 }
  0x61   : > { %2377 = vmatprep.mubr.msk.bf16.mxu1 %vm468_vm3, %v2098_v22 }
  0x67   : > { %2458 = vmatmul.mubr.msk.bf16.gmra.mrb[8].mxu0 %vm468_vm3, %v2080_v51 }
  0x68   : > { %2378 = vmatmul.mubr.msk.bf16.vlgmr.msra.gmra.mrb[0].mxu1 %vm468_vm3, %v2910_v46  ;;  %2461 = vmatprep.mubr.msk.bf16.mxu0 %vm468_vm3, %v2115_v57  ;;  %v1118_v46 = vshrl.u32 %v3028_v5, 16  ;;  %v1137_v5 = vshll.u32 %v3039_v19, 16 }
  0x69   : > { %2394 = vmatpush3.bf16.msra.mxu1 %v1002_v36  ;;  %2381 = vmatprep.mubr.msk.bf16.mxu1 %vm468_vm3, %v2941_v11 }
  0x6a   : > { %2636 = vmatprep.subr.msk.bf16.mxu1 %vm493_vm0, %v2707_v1  ;;  %v1127_v1 = vshll.u32 %v3017_v53, 16  ;;  %v1120_v34 = vrot.slane %v1118_v46, 4  ;;  %v1139_v49 = vrot.slane %v1137_v5, 5 }
  0x6c   : > { %v1129_v16 = vrot.slane %v1127_v1, 5 }
  0x6e   : > { %v1134_v53 = vor.u32 %v1133_v48, %v1129_v16 }
  0x6f   : > { %2462 = vmatmul.mubr.msk.bf16.gmra.mrb[12].mxu0 %vm468_vm3, %v2146_v42 }
  0x70   : > { %2382 = vmatmul.mubr.msk.bf16.gmra.mrb[4].mxu1 %vm468_vm3, %v2979_v60  ;;  %2467 = vmatprep.mubr.msk.bf16.mxu0 %vm468_vm3, %v2854_v52  ;;  %v1124_v52 = vor.u32 %v1123_v23, %v1120_v34  ;;  %v1135_v37 = vrot.slane %v1134_v53, 4 }
  0x71   : > { %2385 = vmatprep.mubr.msk.bf16.mxu1 %vm468_vm3, %v3011_v44 }
  0x72   : > { %v1125_v32 = vrot.slane %v1124_v52, 4 }
  0x77   : > { %2468 = vmatmul.mubr.msk.bf16.vlgmr.msra.gmra.mrb[0].mxu0 %vm468_vm3, %v2882_v25  ;;  %v1130_v25 = vsel %vm2778_vm4, %v1125_v32, %v1129_v16 }
  0x78   : > { %2386 = vmatmul.mubr.msk.bf16.gmra.mrb[8].mxu1 %vm468_vm3, %v3021_v59  ;;  %2484 = vmatpush3.bf16.msra.mxu0 %v1688_v58 }
  0x79   : > { %2389 = vmatprep.mubr.msk.bf16.mxu1 %vm468_vm3, %v3050_v27  ;;  %2471 = vmatprep.mubr.msk.bf16.mxu0 %vm468_vm3, %v2908_v43  ;;  %v1140_v43 = vsel %vm2778_vm4, %v1135_v37, %v1139_v49 }
  0x7a   : > { %v2125_v19 = vcombine.low %v1130_v25, %v1140_v43 }
  0x7f   : > { %2472 = vmatmul.mubr.msk.bf16.gmra.mrb[4].mxu0 %vm468_vm3, %v2957_v40 }
  0x80   : > { %2390 = vmatmul.mubr.msk.bf16.gmra.mrb[12].mxu1 %vm468_vm3, %v3061_v35  ;;  %2475 = vmatprep.mubr.msk.bf16.mxu0 %vm468_vm3, %v2982_v10 }
  0x81   : > { %2395 = vmatprep.mubr.msk.bf16.mxu1 %vm468_vm3, %v3059_v9 }
  0x87   : > { %2476 = vmatmul.mubr.msk.bf16.gmra.mrb[8].mxu0 %vm468_vm3, %v3019_v55 }
  0x88   : > { %2396 = vmatmul.mubr.msk.bf16.vlgmr.msra.gmra.mrb[0].mxu1 %vm468_vm3, %v3070_v47  ;;  %2479 = vmatprep.mubr.msk.bf16.mxu0 %vm468_vm3, %v2125_v19 }
  0x89   : > { %2502 = vmatpush3.bf16.msra.mxu1 %v2715_v3  ;;  %2399 = vmatprep.mubr.msk.bf16.mxu1 %vm468_vm3, %v3103_v24 }
  0x8f   : > { %2480 = vmatmul.mubr.msk.bf16.gmra.mrb[12].mxu0 %vm468_vm3, %v2156_v28 }
  0x90   : > { %2400 = vmatmul.mubr.msk.bf16.gmra.mrb[4].mxu1 %vm468_vm3, %v3107_v26  ;;  %2485 = vmatprep.mubr.msk.bf16.mxu0 %vm468_vm3, %v2941_v11 }
  0x91   : > { %2403 = vmatprep.mubr.msk.bf16.mxu1 %vm468_vm3, %v3133_v62 }
  0x97   : > { %2486 = vmatmul.mubr.msk.bf16.vlgmr.msra.gmra.mrb[0].mxu0 %vm468_vm3, %v2979_v60 }
  0x98   : > { %2404 = vmatmul.mubr.msk.bf16.gmra.mrb[8].mxu1 %vm468_vm3, %v3139_v4  ;;  %2489 = vmatprep.mubr.msk.bf16.mxu0 %vm468_vm3, %v3011_v44 }
  0x99   : > { %2407 = vmatprep.mubr.msk.bf16.mxu1 %vm468_vm3, %v2080_v51 }
  0x9f   : > { %2490 = vmatmul.mubr.msk.bf16.gmra.mrb[4].mxu0 %vm468_vm3, %v3021_v59 }
  0xa0   : > { %2408 = vmatmul.mubr.msk.bf16.gmra.mrb[12].mxu1 %vm468_vm3, %v2115_v57  ;;  %2493 = vmatprep.mubr.msk.bf16.mxu0 %vm468_vm3, %v3050_v27 }
  0xa1   : > { %2421 = vmatprep.mubr.msk.bf16.mxu1 %vm468_vm3, %v2957_v40 }
  0xa7   : > { %2494 = vmatmul.mubr.msk.bf16.gmra.mrb[8].mxu0 %vm468_vm3, %v3061_v35 }
  0xa8   : > { %2422 = vmatmul.mubr.msk.bf16.vlgmr.msra.gmra.mrb[8].mxu1 %vm468_vm3, %v2982_v10  ;;  %2497 = vmatprep.mubr.msk.bf16.mxu0 %vm468_vm3, %v3096_v12 }
  0xa9   : > { %2425 = vmatprep.mubr.msk.bf16.mxu1 %vm468_vm3, %v3019_v55 }
  0xaf   : > { %2498 = vmatmul.mubr.msk.bf16.gmra.mrb[12].mxu0 %vm468_vm3, %v2167_v61 }
  0xb0   : > { %2426 = vmatmul.mubr.msk.bf16.gmra.mrb[12].mxu1 %vm468_vm3, %v2125_v19 }
 0x15b   : > { %v2397_v3 = vpop.f32.mrb[0].mxu1 }
 0x15c   : > { %v1038_v33 = vpop.f32.mrb[1].mxu1 }
 0x15d   : > { %v2398_v11 = vpop.f32.mrb[2].mxu1 }
 0x15e   : > { %v1041_v40 = vpop.f32.mrb[3].mxu1 }
 0x163   : > { %v2401_v60 = vpop.f32.mrb[4].mxu1 }
 0x164   : > { %v1054_v10 = vpop.f32.mrb[5].mxu1 }
 0x165   : > { %v2402_v44 = vpop.f32.mrb[6].mxu1 }
 0x166   : > { %v1057_v59 = vpop.f32.mrb[7].mxu1 }
 0x16a   : > { %v2487_v27 = vpop.f32.mrb[0].mxu0 }
 0x16b   : > { %v2503_v9 = vadd.f32 %v2487_v27, %v2397_v3  ;;  %v1724_v35 = vpop.f32.mrb[1].mxu0 }
 0x16c   : > { %v2504_v55 = vadd.f32 %v1724_v35, %v1038_v33  ;;  %v2488_v47 = vpop.f32.mrb[2].mxu0 }
 0x16d   : > { %v2505_v6 = vadd.f32 %v2488_v47, %v2398_v11  ;;  %v1727_v17 = vpop.f32.mrb[3].mxu0  ;;  %v1907_v15 = vmul.f32 %v2503_v9, %v2503_v9 }
 0x16e   : > { %v2506_v22 = vadd.f32 %v1727_v17, %v1041_v40  ;;  %v1905_v63 = vmul.f32 %v2504_v55, %v2504_v55 }
 0x16f   : > { %v2219_v50 = vpack.c.bf16 %v2505_v6, %v2503_v9  ;;  %v1908_v26 = vmul.f32 %v2505_v6, %v2505_v6 }
 0x170   : > { %v2214_v54 = vpack.c.bf16 %v2506_v22, %v2504_v55  ;;  %v1883_v12 = vadd.f32 %v2506_v22, %v2504_v55  ;;  %v1906_v45 = vmul.f32 %v2506_v22, %v2506_v22 }
 0x171   : > { %2251 = vst [vmem:[%s3253_s18 + $0x8] sm:$0xff] %v2219_v50  }
 0x172   : > { %2215 = vst [vmem:[%s3253_s18] sm:$0xff] %v2214_v54   ;;  %v1884_v39 = vadd.f32 %v2503_v9, %v1883_v12  ;;  %v1921_v2 = vadd.f32 %v1906_v45, %v1905_v63  ;;  %v2491_v21 = vpop.f32.mrb[4].mxu0 }
 0x173   : > { %v2507_v38 = vadd.f32 %v2491_v21, %v2401_v60  ;;  %v1740_v24 = vpop.f32.mrb[5].mxu0 }
 0x174   : > { %v1922_v18 = vadd.f32 %v1921_v2, %v1907_v15  ;;  %v2508_v30 = vadd.f32 %v1740_v24, %v1054_v10  ;;  %v1885_v31 = vadd.f32 %v2505_v6, %v1884_v39  ;;  %v2492_v7 = vpop.f32.mrb[6].mxu0 }
 0x175   : > { %v2509_v41 = vadd.f32 %v2492_v7, %v2402_v44  ;;  %v1743_v8 = vpop.f32.mrb[7].mxu0  ;;  %v1911_v57 = vmul.f32 %v2507_v38, %v2507_v38 }
 0x176   : > { %v1886_v56 = vadd.f32 %v2508_v30, %v1885_v31  ;;  %v1909_v61 = vmul.f32 %v2508_v30, %v2508_v30  ;;  %v1923_v13 = vadd.f32 %v1922_v18, %v1908_v26  ;;  %v2510_v28 = vadd.f32 %v1743_v8, %v1057_v59 }
 0x177   : > { %v2229_v62 = vpack.c.bf16 %v2509_v41, %v2507_v38  ;;  %v1912_v29 = vmul.f32 %v2509_v41, %v2509_v41 }
 0x178   : > { %v1924_v20 = vadd.f32 %v1923_v13, %v1909_v61  ;;  %v2224_v4 = vpack.c.bf16 %v2510_v28, %v2508_v30  ;;  %v1887_v14 = vadd.f32 %v2510_v28, %v1886_v56  ;;  %v1910_v51 = vmul.f32 %v2510_v28, %v2510_v28 }
 0x179   : > { %2253 = vst [vmem:[%s3253_s18 + $0x18] sm:$0xff] %v2229_v62  }
 0x17a   : > { %2252 = vst [vmem:[%s3253_s18 + $0x10] sm:$0xff] %v2224_v4   ;;  %v1888_v36 = vadd.f32 %v2507_v38, %v1887_v14  ;;  %v1925_v42 = vadd.f32 %v1924_v20, %v1910_v51  ;;  %v2495_v46 = vpop.f32.mrb[8].mxu0 }
 0x17b   : > { %v2423_v0 = vpop.f32.mrb[8].mxu1  ;;  %v1756_v1 = vpop.f32.mrb[9].mxu0 }
 0x17c   : > { %v1926_v58 = vadd.f32 %v1925_v42, %v1911_v57  ;;  %v2511_v34 = vadd.f32 %v2495_v46, %v2423_v0  ;;  %v1218_v23 = vpop.f32.mrb[9].mxu1  ;;  %v1889_v16 = vadd.f32 %v2509_v41, %v1888_v36  ;;  %v2496_v48 = vpop.f32.mrb[10].mxu0 }
 0x17d   : > { %v2512_v52 = vadd.f32 %v1756_v1, %v1218_v23  ;;  %v2424_v53 = vpop.f32.mrb[10].mxu1  ;;  %v1759_v5 = vpop.f32.mrb[11].mxu0 }
 0x17e   : > { %v1927_v32 = vadd.f32 %v1926_v58, %v1912_v29  ;;  %v2513_v37 = vadd.f32 %v2496_v48, %v2424_v53  ;;  %v1221_v49 = vpop.f32.mrb[11].mxu1  ;;  %v1915_v44 = vmul.f32 %v2511_v34, %v2511_v34 }
 0x17f   : > { %v1890_v25 = vadd.f32 %v2512_v52, %v1889_v16  ;;  %v1913_v43 = vmul.f32 %v2512_v52, %v2512_v52  ;;  %v2514_v19 = vadd.f32 %v1759_v5, %v1221_v49 }
 0x180   : > { %v2239_v3 = vpack.c.bf16 %v2513_v37, %v2511_v34  ;;  %v1916_v17 = vmul.f32 %v2513_v37, %v2513_v37 }
 0x181   : > { %v1928_v33 = vadd.f32 %v1927_v32, %v1913_v43  ;;  %v2234_v11 = vpack.c.bf16 %v2514_v19, %v2512_v52  ;;  %v1891_v40 = vadd.f32 %v2514_v19, %v1890_v25  ;;  %v1914_v60 = vmul.f32 %v2514_v19, %v2514_v19 }
 0x182   : > { %2255 = vst [vmem:[%s3253_s18 + $0x28] sm:$0xff] %v2239_v3   ;;  %v2499_v10 = vpop.f32.mrb[12].mxu0 }
 0x183   : > { %2254 = vst [vmem:[%s3253_s18 + $0x20] sm:$0xff] %v2234_v11   ;;  %v1892_v59 = vadd.f32 %v2511_v34, %v1891_v40  ;;  %v1929_v27 = vadd.f32 %v1928_v33, %v1914_v60  ;;  %v2427_v9 = vpop.f32.mrb[12].mxu1  ;;  %v1772_v35 = vpop.f32.mrb[13].mxu0 }
 0x184   : > { %v2515_v55 = vadd.f32 %v2499_v10, %v2427_v9  ;;  %v1234_v47 = vpop.f32.mrb[13].mxu1  ;;  %v2500_v6 = vpop.f32.mrb[14].mxu0 }
 0x185   : > { %v1930_v22 = vadd.f32 %v1929_v27, %v1915_v44  ;;  %v2516_v50 = vadd.f32 %v1772_v35, %v1234_v47  ;;  %v1893_v63 = vadd.f32 %v2513_v37, %v1892_v59  ;;  %v2428_v54 = vpop.f32.mrb[14].mxu1  ;;  %v1775_v12 = vpop.f32.mrb[15].mxu0 }
 0x186   : > { %v2517_v45 = vadd.f32 %v2500_v6, %v2428_v54  ;;  %v1237_v15 = vpop.f32.mrb[15].mxu1  ;;  %v1919_v7 = vmul.f32 %v2515_v55, %v2515_v55 }
 0x187   : > { %v1894_v39 = vadd.f32 %v2516_v50, %v1893_v63  ;;  %v1917_v2 = vmul.f32 %v2516_v50, %v2516_v50  ;;  %v1931_v21 = vadd.f32 %v1930_v22, %v1916_v17  ;;  %v2518_v38 = vadd.f32 %v1775_v12, %v1237_v15 }
 0x188   : > { %v2249_v24 = vpack.c.bf16 %v2517_v45, %v2515_v55  ;;  %v1920_v56 = vmul.f32 %v2517_v45, %v2517_v45 }
 0x189   : > { %v1932_v26 = vadd.f32 %v1931_v21, %v1917_v2  ;;  %v2244_v18 = vpack.c.bf16 %v2518_v38, %v2516_v50  ;;  %v1895_v30 = vadd.f32 %v2518_v38, %v1894_v39  ;;  %v1918_v31 = vmul.f32 %v2518_v38, %v2518_v38 }
 0x18a   : > { %2257 = vst [vmem:[%s3253_s18 + $0x38] sm:$0xff] %v2249_v24  }
 0x18b   : > { %2256 = vst [vmem:[%s3253_s18 + $0x30] sm:$0xff] %v2244_v18   ;;  %v1896_v41 = vadd.f32 %v2515_v55, %v1895_v30  ;;  %v1933_v8 = vadd.f32 %v1932_v26, %v1918_v31 }
 0x18d   : > { %v1897_v61 = vadd.f32 %v2517_v45, %v1896_v41  ;;  %v1934_v13 = vadd.f32 %v1933_v8, %v1919_v7 }
 0x18f   : > { %v1898_v28 = vrot.slane %v1897_v61, 4  ;;  %v1935_v62 = vadd.f32 %v1934_v13, %v1920_v56 }
 0x191   : > { %v1899_v20 = vadd.f32 %v1898_v28, %v1897_v61  ;;  %v1936_v4 = vrot.slane %v1935_v62, 4 }
 0x193   : > { %v1900_v14 = vrot.slane %v1899_v20, 2  ;;  %v1937_v51 = vadd.f32 %v1936_v4, %v1935_v62 }
 0x195   : > { %v1901_v57 = vadd.f32 %v1900_v14, %v1899_v20  ;;  %v1938_v36 = vrot.slane %v1937_v51, 2 }
 0x197   : > { %v1902_v42 = vrot.slane %v1901_v57, 1  ;;  %v1939_v46 = vadd.f32 %v1938_v36, %v1937_v51 }
 0x199   : > { %v1903_v0 = vadd.f32 %v1902_v42, %v1901_v57  ;;  %v1940_v1 = vrot.slane %v1939_v46, 1 }
 0x19b   : > { %1904 = vst [vmem:[%s211_s21] sm:$0x1] %v1903_v0  ;;  %v1941_v29 = vadd.f32 %v1940_v1, %v1939_v46 }
 0x19d   : > { %1942 = vst [vmem:[%s214_s24] sm:$0x1] %v1941_v29 }
 0x19e PF: > { %s15_s15 = sadd.s32 1, %s2666_s15  }
 0x19f   : > { %p12_p4 = scmp.ge.s32.totalorder %s15_s15, 6  }
 0x1a1   :  { %14 = sbr.rel (!%p12_p4) target bundleno = 1 (0x1), region = 90 }

</bundles_post_ra>
